<compile_context>
chip_gen: v7x
topology: tpu7x:2x2x1
jax: 0.10.0
libtpu: 0.0.40
codegen_flags: <defaults>
</compile_context>

<pallas_src>
import functools

import jax
import jax.numpy as jnp
from jax.experimental import pallas as pl
from jax.experimental.pallas import tpu as pltpu


_TARGET_M = 1024          # target matmul rows per grid step
_SUBLANE = 8


def _cdiv(a, b):
    return -(-a // b)


def _round_up(x, m):
    return _cdiv(x, m) * m


# ----------------------------------------------------------------------------
# Pallas kernel: per-band fused conv = tap-accumulated matmuls + bias + SiLU.
# ----------------------------------------------------------------------------
def _conv_band_kernel(x_ref, w_ref, b_ref, o_ref, *, tap_offsets, m_rows,
                      apply_silu):
    # x_ref : (band_in, Cg)      bf16   banded, halo'ed, flattened activations
    # w_ref : (T, Cg, Cout)      bf16   resident weights, one (Cg, Cout) per tap
    # b_ref : (1, Cout)          f32
    # o_ref : (m_rows, Cout)     out dtype
    off0 = tap_offsets[0]
    acc = jnp.dot(x_ref[off0:off0 + m_rows, :], w_ref[0],
                  preferred_element_type=jnp.float32)
    for t in range(1, len(tap_offsets)):
        off = tap_offsets[t]
        acc = acc + jnp.dot(x_ref[off:off + m_rows, :], w_ref[t],
                            preferred_element_type=jnp.float32)
    acc = acc + b_ref[...]
    if apply_silu:
        acc = acc * jax.nn.sigmoid(acc)       # SiLU(x) = x * sigmoid(x)
    o_ref[...] = acc.astype(o_ref.dtype)


def _conv_bands_call(x_bands, w_taps, bias, *, nbands, band_in, m_rows,
                     tap_offsets, apply_silu, out_dtype):
    cg = x_bands.shape[-1]
    num_taps, _, cout = w_taps.shape
    kernel = functools.partial(_conv_band_kernel,
                               tap_offsets=tuple(tap_offsets),
                               m_rows=m_rows, apply_silu=apply_silu)
    return pl.pallas_call(
        kernel,
        out_shape=jax.ShapeDtypeStruct((nbands * m_rows, cout), out_dtype),
        grid=(nbands,),
        in_specs=[
            pl.BlockSpec((band_in, cg), lambda i: (i, 0)),
            pl.BlockSpec((num_taps, cg, cout), lambda i: (0, 0, 0)),
            pl.BlockSpec((1, cout), lambda i: (0, 0)),
        ],
        out_specs=pl.BlockSpec((m_rows, cout), lambda i: (i, 0)),
        compiler_params=pltpu.CompilerParams(
            dimension_semantics=("parallel",),
            vmem_limit_bytes=32 * 1024 * 1024),
    )(x_bands, w_taps, bias)


# ----------------------------------------------------------------------------
# Weight rewrite: 3x3 stride-2 conv == 2x2 stride-1 conv on space-to-depth
# input with 4*Cin channels (channel order = (row_parity, col_parity, cin)).
# ----------------------------------------------------------------------------
def _space_to_depth_weight(w_hwio):
    cin, cout = w_hwio.shape[2], w_hwio.shape[3]
    w2 = jnp.zeros((2, 2, 4, cin, cout), w_hwio.dtype)
    for dh in range(2):
        for dw in range(2):
            for p in range(4):
                kh, kw = 2 * dh + p // 2, 2 * dw + p % 2
                if kh < 3 and kw < 3:
                    w2 = w2.at[dh, dw, p].set(w_hwio[kh, kw])
    return w2.reshape(4, 4 * cin, cout)


# ----------------------------------------------------------------------------
# 3x3 conv, padding=1, stride in {1, 2}.  Fused Pallas kernel, NHWC.
# ----------------------------------------------------------------------------
def conv3x3(x_nhwc, w_hwio, bias, *, stride=1, apply_silu=False,
            out_dtype=jnp.bfloat16):
    n, h, w, cin = x_nhwc.shape
    cout = w_hwio.shape[-1]

    if stride == 1:
        ho, wo = h, w
        xp = jnp.pad(x_nhwc, ((0, 0), (1, 1), (1, 1), (0, 0)))
        hr, wr, cg = h + 2, w + 2, cin
        tap_offsets = [kh * wr + kw for kh in range(3) for kw in range(3)]
        w_taps = w_hwio.reshape(9, cin, cout)
    elif stride == 2:
        ho, wo = (h - 1) // 2 + 1, (w - 1) // 2 + 1
        xp = jnp.pad(x_nhwc, ((0, 0), (1, 1), (1, 1), (0, 0)))
        hp, wp = h + 2, w + 2
        hpe, wpe = _round_up(hp, 2), _round_up(wp, 2)
        xp = jnp.pad(xp, ((0, 0), (0, hpe - hp), (0, wpe - wp), (0, 0)))
        hr, wr, cg = hpe // 2, wpe // 2, 4 * cin
        # space-to-depth: channel = (row_parity*2 + col_parity)*cin + c
        xp = xp.reshape(n, hr, 2, wr, 2, cin).transpose(0, 1, 3, 2, 4, 5)
        xp = xp.reshape(n, hr, wr, cg)
        tap_offsets = [dh * wr + dw for dh in range(2) for dw in range(2)]
        w_taps = _space_to_depth_weight(w_hwio)
    else:
        raise ValueError(f"unsupported stride {stride}")

    # Flatten image rows: every tap is now a contiguous flat-row window.
    x_flat = xp.reshape(n, hr * wr, cg).astype(jnp.bfloat16)

    # Row-band tiling with halo (targets ~_TARGET_M matmul rows per step).
    r0 = max(1, min(ho, _cdiv(_TARGET_M, wr)))
    nb = _cdiv(ho, r0)
    rows_per_band = _cdiv(ho, nb)
    band_stride = rows_per_band * wr                   # real rows per band
    m_rows = _round_up(band_stride, _SUBLANE)          # rows computed per step
    band_in = _round_up(m_rows + tap_offsets[-1], _SUBLANE)

    l_need = (nb - 1) * band_stride + band_in
    l_have = hr * wr
    if l_need > l_have:
        x_flat = jnp.pad(x_flat, ((0, 0), (0, l_need - l_have), (0, 0)))

    # Materialize the (slightly overlapping) bands; overlap is only the 2-row
    # halo, so HBM duplication is ~(1 + 2/rows_per_band), not 9x.
    band_idx = (jnp.arange(nb, dtype=jnp.int32)[:, None] * band_stride
                + jnp.arange(band_in, dtype=jnp.int32)[None, :]).reshape(-1)
    x_bands = jnp.take(x_flat, band_idx, axis=1)       # (n, nb*band_in, cg)
    x_bands = x_bands.reshape(n * nb * band_in, cg)

    out = _conv_bands_call(
        x_bands, w_taps.astype(jnp.bfloat16),
        bias.astype(jnp.float32).reshape(1, cout),
        nbands=n * nb, band_in=band_in, m_rows=m_rows,
        tap_offsets=tap_offsets, apply_silu=apply_silu, out_dtype=out_dtype)

    # (n*nb*m_rows, cout) -> (n, ho, wo, cout): drop pad rows + wide columns.
    out = out.reshape(n, nb, m_rows, cout)[:, :, :band_stride, :]
    out = out.reshape(n, nb * rows_per_band, wr, cout)[:, :ho, :wo, :]
    return out


# ----------------------------------------------------------------------------
# Parameter init (deterministic, Gaussian; conv_out is zero-initialized).
# ----------------------------------------------------------------------------
def init_params(key, conditioning_embedding_channels, conditioning_channels=3,
                block_out_channels=(16, 32, 96, 256)):
    def conv_params(k, cin, cout, zero=False):
        if zero:
            return {"w": jnp.zeros((3, 3, cin, cout), jnp.float32),
                    "b": jnp.zeros((cout,), jnp.float32)}
        k1, k2 = jax.random.split(k)
        return {"w": 0.05 * jax.random.normal(k1, (3, 3, cin, cout), jnp.float32),
                "b": 0.05 * jax.random.normal(k2, (cout,), jnp.float32)}

    n_blocks = 2 * (len(block_out_channels) - 1)
    keys = jax.random.split(key, 1 + n_blocks)
    params = {"conv_in": conv_params(keys[0], conditioning_channels,
                                     block_out_channels[0])}
    blocks = []
    ki = 1
    for i in range(len(block_out_channels) - 1):
        cin = block_out_channels[i]
        cout = block_out_channels[i + 1]
        blocks.append(conv_params(keys[ki], cin, cin)); ki += 1     # stride 1
        blocks.append(conv_params(keys[ki], cin, cout)); ki += 1    # stride 2
    params["blocks"] = blocks
    params["conv_out"] = conv_params(None, block_out_channels[-1],
                                     conditioning_embedding_channels, zero=True)
    return params


# ----------------------------------------------------------------------------
# Forward pass (matches ControlNetConditioningEmbedding.forward).
# ----------------------------------------------------------------------------
def controlnet_conditioning_embedding(params, conditioning_nchw):
    # NCHW in -> NHWC internal (bf16 between layers) -> NCHW out (1-tuple).
    x = jnp.transpose(conditioning_nchw, (0, 2, 3, 1)).astype(jnp.float32)
    x = conv3x3(x, params["conv_in"]["w"], params["conv_in"]["b"],
                stride=1, apply_silu=True, out_dtype=jnp.bfloat16)
    for i, blk in enumerate(params["blocks"]):
        stride = 2 if (i % 2 == 1) else 1
        x = conv3x3(x, blk["w"], blk["b"], stride=stride, apply_silu=True,
                    out_dtype=jnp.bfloat16)
    x = conv3x3(x, params["conv_out"]["w"], params["conv_out"]["b"],
                stride=1, apply_silu=False, out_dtype=jnp.float32)
    return (jnp.transpose(x, (0, 3, 1, 2)),)


# ----------------------------------------------------------------------------
# Pure-JAX reference for spot-checking the fused conv kernel.
# ----------------------------------------------------------------------------
def _conv_ref(x_nhwc, w_hwio, bias, stride, apply_silu):
    out = jax.lax.conv_general_dilated(
        x_nhwc.astype(jnp.float32), w_hwio.astype(jnp.float32),
        window_strides=(stride, stride), padding=((1, 1), (1, 1)),
        dimension_numbers=("NHWC", "HWIO", "NHWC"))
    out = out + bias.reshape(1, 1, 1, -1)
    if apply_silu:
        out = out * jax.nn.sigmoid(out)
    return out


if __name__ == "__main__":
    key = jax.random.PRNGKey(0)
    k_param, k_input, k_cx, k_cw, k_cb = jax.random.split(key, 5)

    # --- spot-check the fused conv kernel (stride 1 and 2, odd sizes) -------
    xs = jax.random.normal(k_cx, (2, 15, 17, 8), jnp.float32)
    ws = 0.1 * jax.random.normal(k_cw, (3, 3, 8, 16), jnp.float32)
    bs = 0.1 * jax.random.normal(k_cb, (16,), jnp.float32)
    for stride in (1, 2):
        got = conv3x3(xs, ws, bs, stride=stride, apply_silu=True,
                      out_dtype=jnp.float32)
        want = _conv_ref(xs, ws, bs, stride, True)
        assert got.shape == want.shape, (got.shape, want.shape)
        assert bool(jnp.allclose(got, want, atol=5e-2, rtol=5e-2)), \
            f"conv3x3 stride={stride} mismatch vs reference"

    # --- full module forward ------------------------------------------------
    N, C, H, W = 2, 3, 32, 32
    emb_channels = 32
    params = init_params(k_param, conditioning_embedding_channels=emb_channels,
                         conditioning_channels=C,
                         block_out_channels=(16, 32, 96, 256))
    conditioning = jax.random.normal(k_input, (N, C, H, W), jnp.float32)

    fwd = jax.jit(lambda c: controlnet_conditioning_embedding(params, c))
    (embedding,) = fwd(conditioning)
    jax.block_until_ready(embedding)

    # Sanity: 3 stride-2 convs: 32 -> 16 -> 8 -> 4; channels -> emb_channels.
    assert embedding.shape == (N, emb_channels, H // 8, W // 8), embedding.shape
    assert bool(jnp.all(jnp.isfinite(embedding)))
    print("KERNEL_OK")
</pallas_src>

<mosaic_0001>
module attributes {stable_mosaic.version = 11 : i64} {
  func.func @_conv_band_kernel(%arg0: i32, %arg1: memref<328x8xbf16, #tpu.memory_space<vmem>>, %arg2: memref<9x8x16xbf16, #tpu.memory_space<vmem>>, %arg3: memref<1x16xf32, #tpu.memory_space<vmem>>, %arg4: memref<288x16xf32, #tpu.memory_space<vmem>>) attributes {dimension_semantics = [#tpu.dimension_semantics<parallel>], iteration_bounds = array<i64: 2>, scalar_prefetch = 0 : i64, scratch_operands = 0 : i64, tpu.core_type = #tpu.core_type<tc>, window_params = [{transform_indices = @transform_0, window_bounds = array<i64: 328, 8>}, {pipeline_mode = #tpu.pipeline_mode<synchronous>, transform_indices = @transform_1, window_bounds = array<i64: 9, 8, 16>}, {pipeline_mode = #tpu.pipeline_mode<synchronous>, transform_indices = @transform_2, window_bounds = array<i64: 1, 16>}, {transform_indices = @transform_3, window_bounds = array<i64: 288, 16>}]} {
    %c0 = arith.constant 0 : index
    %c0_0 = arith.constant 0 : index
    %0 = vector.load %arg1[%c0, %c0_0] : memref<328x8xbf16, #tpu.memory_space<vmem>>, vector<288x8xbf16>
    %c0_1 = arith.constant 0 : index
    %c0_2 = arith.constant 0 : index
    %c0_3 = arith.constant 0 : index
    %1 = vector.load %arg2[%c0_1, %c0_2, %c0_3] : memref<9x8x16xbf16, #tpu.memory_space<vmem>>, vector<1x8x16xbf16>
    %2 = vector.shape_cast %1 : vector<1x8x16xbf16> to vector<8x16xbf16>
    %cst = arith.constant dense<0.000000e+00> : vector<288x16xf32>
    %3 = tpu.matmul %0, %2, %cst {dimension_numbers = #tpu.dot_dimension_numbers<[1], [0], [0], [1], [0, 0, 1, 1], [], []>} : vector<288x8xbf16>, vector<8x16xbf16>, vector<288x16xf32> -> vector<288x16xf32>
    %c1 = arith.constant 1 : index
    %c0_4 = arith.constant 0 : index
    %4 = vector.load %arg1[%c1, %c0_4] : memref<328x8xbf16, #tpu.memory_space<vmem>>, vector<288x8xbf16>
    %c1_5 = arith.constant 1 : index
    %c0_6 = arith.constant 0 : index
    %c0_7 = arith.constant 0 : index
    %5 = vector.load %arg2[%c1_5, %c0_6, %c0_7] : memref<9x8x16xbf16, #tpu.memory_space<vmem>>, vector<1x8x16xbf16>
    %6 = vector.shape_cast %5 : vector<1x8x16xbf16> to vector<8x16xbf16>
    %cst_8 = arith.constant dense<0.000000e+00> : vector<288x16xf32>
    %7 = tpu.matmul %4, %6, %cst_8 {dimension_numbers = #tpu.dot_dimension_numbers<[1], [0], [0], [1], [0, 0, 1, 1], [], []>} : vector<288x8xbf16>, vector<8x16xbf16>, vector<288x16xf32> -> vector<288x16xf32>
    %8 = arith.addf %3, %7 : vector<288x16xf32>
    %c2 = arith.constant 2 : index
    %c0_9 = arith.constant 0 : index
    %9 = vector.load %arg1[%c2, %c0_9] : memref<328x8xbf16, #tpu.memory_space<vmem>>, vector<288x8xbf16>
    %c2_10 = arith.constant 2 : index
    %c0_11 = arith.constant 0 : index
    %c0_12 = arith.constant 0 : index
    %10 = vector.load %arg2[%c2_10, %c0_11, %c0_12] : memref<9x8x16xbf16, #tpu.memory_space<vmem>>, vector<1x8x16xbf16>
    %11 = vector.shape_cast %10 : vector<1x8x16xbf16> to vector<8x16xbf16>
    %cst_13 = arith.constant dense<0.000000e+00> : vector<288x16xf32>
    %12 = tpu.matmul %9, %11, %cst_13 {dimension_numbers = #tpu.dot_dimension_numbers<[1], [0], [0], [1], [0, 0, 1, 1], [], []>} : vector<288x8xbf16>, vector<8x16xbf16>, vector<288x16xf32> -> vector<288x16xf32>
    %13 = arith.addf %8, %12 : vector<288x16xf32>
    %c19 = arith.constant 19 : index
    %c0_14 = arith.constant 0 : index
    %14 = vector.load %arg1[%c19, %c0_14] : memref<328x8xbf16, #tpu.memory_space<vmem>>, vector<288x8xbf16>
    %c3 = arith.constant 3 : index
    %c0_15 = arith.constant 0 : index
    %c0_16 = arith.constant 0 : index
    %15 = vector.load %arg2[%c3, %c0_15, %c0_16] : memref<9x8x16xbf16, #tpu.memory_space<vmem>>, vector<1x8x16xbf16>
    %16 = vector.shape_cast %15 : vector<1x8x16xbf16> to vector<8x16xbf16>
    %cst_17 = arith.constant dense<0.000000e+00> : vector<288x16xf32>
    %17 = tpu.matmul %14, %16, %cst_17 {dimension_numbers = #tpu.dot_dimension_numbers<[1], [0], [0], [1], [0, 0, 1, 1], [], []>} : vector<288x8xbf16>, vector<8x16xbf16>, vector<288x16xf32> -> vector<288x16xf32>
    %18 = arith.addf %13, %17 : vector<288x16xf32>
    %c20 = arith.constant 20 : index
    %c0_18 = arith.constant 0 : index
    %19 = vector.load %arg1[%c20, %c0_18] : memref<328x8xbf16, #tpu.memory_space<vmem>>, vector<288x8xbf16>
    %c4 = arith.constant 4 : index
    %c0_19 = arith.constant 0 : index
    %c0_20 = arith.constant 0 : index
    %20 = vector.load %arg2[%c4, %c0_19, %c0_20] : memref<9x8x16xbf16, #tpu.memory_space<vmem>>, vector<1x8x16xbf16>
    %21 = vector.shape_cast %20 : vector<1x8x16xbf16> to vector<8x16xbf16>
    %cst_21 = arith.constant dense<0.000000e+00> : vector<288x16xf32>
    %22 = tpu.matmul %19, %21, %cst_21 {dimension_numbers = #tpu.dot_dimension_numbers<[1], [0], [0], [1], [0, 0, 1, 1], [], []>} : vector<288x8xbf16>, vector<8x16xbf16>, vector<288x16xf32> -> vector<288x16xf32>
    %23 = arith.addf %18, %22 : vector<288x16xf32>
    %c21 = arith.constant 21 : index
    %c0_22 = arith.constant 0 : index
    %24 = vector.load %arg1[%c21, %c0_22] : memref<328x8xbf16, #tpu.memory_space<vmem>>, vector<288x8xbf16>
    %c5 = arith.constant 5 : index
    %c0_23 = arith.constant 0 : index
    %c0_24 = arith.constant 0 : index
    %25 = vector.load %arg2[%c5, %c0_23, %c0_24] : memref<9x8x16xbf16, #tpu.memory_space<vmem>>, vector<1x8x16xbf16>
    %26 = vector.shape_cast %25 : vector<1x8x16xbf16> to vector<8x16xbf16>
    %cst_25 = arith.constant dense<0.000000e+00> : vector<288x16xf32>
    %27 = tpu.matmul %24, %26, %cst_25 {dimension_numbers = #tpu.dot_dimension_numbers<[1], [0], [0], [1], [0, 0, 1, 1], [], []>} : vector<288x8xbf16>, vector<8x16xbf16>, vector<288x16xf32> -> vector<288x16xf32>
    %28 = arith.addf %23, %27 : vector<288x16xf32>
    %c38 = arith.constant 38 : index
    %c0_26 = arith.constant 0 : index
    %29 = vector.load %arg1[%c38, %c0_26] : memref<328x8xbf16, #tpu.memory_space<vmem>>, vector<288x8xbf16>
    %c6 = arith.constant 6 : index
    %c0_27 = arith.constant 0 : index
    %c0_28 = arith.constant 0 : index
    %30 = vector.load %arg2[%c6, %c0_27, %c0_28] : memref<9x8x16xbf16, #tpu.memory_space<vmem>>, vector<1x8x16xbf16>
    %31 = vector.shape_cast %30 : vector<1x8x16xbf16> to vector<8x16xbf16>
    %cst_29 = arith.constant dense<0.000000e+00> : vector<288x16xf32>
    %32 = tpu.matmul %29, %31, %cst_29 {dimension_numbers = #tpu.dot_dimension_numbers<[1], [0], [0], [1], [0, 0, 1, 1], [], []>} : vector<288x8xbf16>, vector<8x16xbf16>, vector<288x16xf32> -> vector<288x16xf32>
    %33 = arith.addf %28, %32 : vector<288x16xf32>
    %c39 = arith.constant 39 : index
    %c0_30 = arith.constant 0 : index
    %34 = vector.load %arg1[%c39, %c0_30] : memref<328x8xbf16, #tpu.memory_space<vmem>>, vector<288x8xbf16>
    %c7 = arith.constant 7 : index
    %c0_31 = arith.constant 0 : index
    %c0_32 = arith.constant 0 : index
    %35 = vector.load %arg2[%c7, %c0_31, %c0_32] : memref<9x8x16xbf16, #tpu.memory_space<vmem>>, vector<1x8x16xbf16>
    %36 = vector.shape_cast %35 : vector<1x8x16xbf16> to vector<8x16xbf16>
    %cst_33 = arith.constant dense<0.000000e+00> : vector<288x16xf32>
    %37 = tpu.matmul %34, %36, %cst_33 {dimension_numbers = #tpu.dot_dimension_numbers<[1], [0], [0], [1], [0, 0, 1, 1], [], []>} : vector<288x8xbf16>, vector<8x16xbf16>, vector<288x16xf32> -> vector<288x16xf32>
    %38 = arith.addf %33, %37 : vector<288x16xf32>
    %c40 = arith.constant 40 : index
    %c0_34 = arith.constant 0 : index
    %39 = vector.load %arg1[%c40, %c0_34] : memref<328x8xbf16, #tpu.memory_space<vmem>>, vector<288x8xbf16>
    %c8 = arith.constant 8 : index
    %c0_35 = arith.constant 0 : index
    %c0_36 = arith.constant 0 : index
    %40 = vector.load %arg2[%c8, %c0_35, %c0_36] : memref<9x8x16xbf16, #tpu.memory_space<vmem>>, vector<1x8x16xbf16>
    %41 = vector.shape_cast %40 : vector<1x8x16xbf16> to vector<8x16xbf16>
    %cst_37 = arith.constant dense<0.000000e+00> : vector<288x16xf32>
    %42 = tpu.matmul %39, %41, %cst_37 {dimension_numbers = #tpu.dot_dimension_numbers<[1], [0], [0], [1], [0, 0, 1, 1], [], []>} : vector<288x8xbf16>, vector<8x16xbf16>, vector<288x16xf32> -> vector<288x16xf32>
    %43 = arith.addf %38, %42 : vector<288x16xf32>
    %c0_38 = arith.constant 0 : index
    %c0_39 = arith.constant 0 : index
    %44 = vector.load %arg3[%c0_38, %c0_39] : memref<1x16xf32, #tpu.memory_space<vmem>>, vector<1x16xf32>
    %45 = vector.broadcast %44 : vector<1x16xf32> to vector<288x16xf32>
    %46 = arith.addf %43, %45 : vector<288x16xf32>
    %47 = arith.negf %46 : vector<288x16xf32>
    %48 = math.exp %47 : vector<288x16xf32>
    %cst_40 = arith.constant 1.000000e+00 : f32
    %49 = vector.broadcast %cst_40 : f32 to vector<288x16xf32>
    %50 = arith.addf %49, %48 : vector<288x16xf32>
    %51 = arith.divf %49, %50 : vector<288x16xf32>
    %52 = arith.mulf %46, %51 : vector<288x16xf32>
    %c0_41 = arith.constant 0 : index
    %c0_42 = arith.constant 0 : index
    %53 = vector.load %arg4[%c0_41, %c0_42] : memref<288x16xf32, #tpu.memory_space<vmem>>, vector<288x16xf32>
    tpu.vector_store %arg4[%c0_41, %c0_42], %52 {strides = array<i32>} : memref<288x16xf32, #tpu.memory_space<vmem>>, vector<288x16xf32>,
    return
  }
  func.func @transform_0(%arg0: i32) -> (i32, i32) {
    %c0_i32 = arith.constant 0 : i32
    %c0_i32_0 = arith.constant 0 : i32
    return %arg0, %c0_i32 : i32, i32
  }
  func.func @transform_1(%arg0: i32) -> (i32, i32, i32) {
    %c0_i32 = arith.constant 0 : i32
    %c0_i32_0 = arith.constant 0 : i32
    %c0_i32_1 = arith.constant 0 : i32
    %c0_i32_2 = arith.constant 0 : i32
    return %c0_i32, %c0_i32_0, %c0_i32_1 : i32, i32, i32
  }
  func.func @transform_2(%arg0: i32) -> (i32, i32) {
    %c0_i32 = arith.constant 0 : i32
    %c0_i32_0 = arith.constant 0 : i32
    %c0_i32_1 = arith.constant 0 : i32
    return %c0_i32, %c0_i32_0 : i32, i32
  }
  func.func @transform_3(%arg0: i32) -> (i32, i32) {
    %c0_i32 = arith.constant 0 : i32
    %c0_i32_0 = arith.constant 0 : i32
    return %arg0, %c0_i32 : i32, i32
  }
}

</mosaic_0001>

<bundles_post_ra>
// kernel: tpu_custom_call.1
= control target key start
LH: loop header
LB: loop body
LE: loop exit
PB: predicated region body
PF: predicated region fallthrough
CT: control target
= control target key end

     0   :  { %s5425_s12 = smov 0   ;;  %s6857_s0 = inlined_call_operand.vmem [shape: bf16[656,8], index: 0, kind: input, shape index: {}]   ;;  %s6858_s1 = inlined_call_operand.vmem [shape: bf16[9,8,16], index: 1, kind: input, shape index: {}]   ;;  %s6859_s2 = inlined_call_operand.vmem [shape: f32[1,16], index: 2, kind: input, shape index: {}]   ;;  %s6860_s3 = inlined_call_operand.vmem [shape: f32[576,16], index: 3, kind: output, shape index: {}]  }
   0x1 LB: > { %s4037_s13 = sadd.s32 4294967295, %s5403_s12   ;;  %p4041_p0 = scmp.ge.s32.totalorder %s5403_s12, 1  ;;  %s5403_s12 = sphi %s5425_s12, %s13_s12  }
   0x2   : > { %p138_p1 = scmp.lt.s32.totalorder %s5403_s12, 3 }
   0x4   : > { %p139_p2 = pnand %p4041_p0, %p138_p1 }
   0x6   : > { %142 = sbr.rel (%p139_p2) target bundleno = 599 (0x257), region = 32 }
   0xd   : > { %vm512_vm0 = vcmask 1043456   ;;  %v4158_v0 = vld [vmem:[%s6858_s1 + $0x10] sm:$0xf]  ;;  %s162_s16 = smul.u32 41, %s4037_s13  ;;  %v4178_v2 = vld [vmem:[%s6858_s1 + $0x14] sm:$0xf] }
   0xe   : > { %5139 = vmatprep.subr.msk.bf16.mxu0 %vm512_vm0, %v4158_v0  ;;  %v5440_v1 = vsel %vm512_vm0, %v4158_v0, 0  ;;  %v4044_v3 = vld [vmem:[%s6858_s1 + $0x4] sm:$0xf]  ;;  %v211_v5 = vld [vmem:[%s6858_s1] sm:$0xf]  ;;  %vm457_vm1 = vcmask 64512  }
   0xf   : > { %4656 = vmatpush3.bf16.msra.mxu0 %v5440_v1  ;;  %p163_p3 = scmp.lt.s32.totalorder %s162_s16, 81  ;;  %5135 = vmatprep.subr.msk.bf16.mxu1 %vm512_vm0, %v4044_v3  ;;  %v514_v4 = vsel %vm512_vm0, %v4044_v3, 0  ;;  %vm1802_vm2 = vcmask 1045504   ;;  %v2257_v9 = vsel %vm512_vm0, %v4178_v2, 0  ;;  %vm308_vm3 = vsmask.f32 7424 }
  0x10   : > { %5141 = vmatprep.subr.msk.bf16.mxu0 %vm512_vm0, %v4178_v2  ;;  %4504 = vmatpush3.bf16.msra.mxu1 %v514_v4  ;;  %v730_v12 = vsel %vm512_vm0, %v211_v5, 0  ;;  %v5488_v22 = vld [vmem:[%s6858_s1 + $0x18] sm:$0xf]  ;;  %v5524_v44 = vld [vmem:[%s6858_s1 + $0x8] sm:$0xf]  ;;  %vm915_vm6 = vcmask 1046528  }
  0x11   : > { %s7077_s16 = smov (!%p163_p3, %s162_s16), 81  ;;  %5136 = vmatprep.subr.msk.bf16.mxu1 %vm512_vm0, %v211_v5  ;;  %vm2116_vm4 = vsmask.f32 5376  ;;  %vm2918_vm5 = vsmask.f32 4352  ;;  %vm2604_vm7 = vcmask 1044480  }
  0x12   : > { %s4042_s23 = sshll.u32 %s7077_s16, 2  ;;  %vm1355_vm8 = vsmask.f32 6400  ;;  %s6608_s16 = smul.u32 36, %s4037_s13  ;;  %vm3944_vm9 = vcmask 130048  }
  0x13   : > { %s5459_s26 = scalar_lea.vmem %s6857_s0, %s4042_s23 }
  0x14   : > { %v1224_v6 = vld [vmem:[%s5459_s26 + $0xc] sm:$0xf]  ;;  %v5463_v7 = vld [vmem:[%s5459_s26 + $0x10] sm:$0xff]   ;;  %v1796_v8 = vld [vmem:[%s5459_s26 + $0x8] sm:$0xc]  ;;  %p169_p4 = scmp.lt.s32.totalorder %s6608_s16, 71 }
  0x15   : > { %v5467_v10 = vcombine.low %v1796_v8, %v1224_v6  ;;  %v5470_v11 = vld [vmem:[%s5459_s26 + $0x18] sm:$0xff]   ;;  %v1804_v13 = vrot.slane %v5463_v7, 2  ;;  %v175_v14 = vld [vmem:[%s5459_s26] sm:$0xf]  ;;  %v176_v15 = vld [vmem:[%s5459_s26 + $0x4] sm:$0xf] }
  0x16   : > { %v5477_v16 = vld [vmem:[%s5459_s26 + $0x8] sm:$0xff]   ;;  %v1806_v18 = vrot.slane %v5470_v11, 2  ;;  %v5481_v19 = vcombine.low %v175_v14, %v176_v15  ;;  %v5495_v27 = vld [vmem:[%s5459_s26 + $0x10] sm:$0xff]   ;;  %v5498_v28 = vld [vmem:[%s5459_s26 + $0x20] sm:$0xff]   ;;  %s7079_s16 = smov (!%p169_p4, %s6608_s16), 71 }
  0x17   : > { %v1803_v17 = vrot.slane %v5467_v10, 2  ;;  %v317_v20 = vshll.u32 %v5477_v16, 16  ;;  %v321_v21 = vshrl.u32 %v5477_v16, 16  ;;  %v5502_v30 = vld [vmem:[%s5459_s26 + $0x28] sm:$0xff]   ;;  %v325_v32 = vshll.u32 %v5495_v27, 16  ;;  %v5508_v34 = vld [vmem:[%s5459_s26 + $0x18] sm:$0xff]  }
  0x18   : > { %v1807_v24 = vsel %vm1802_vm2, %v1804_v13, %v1806_v18  ;;  %v310_v25 = vshrl.u32 %v5481_v19, 16  ;;  %v312_v26 = vshll.u32 %v5481_v19, 16  ;;  %v1808_v33 = vrot.slane %v5498_v28, 2  ;;  %v5518_v42 = vld [vmem:[%s5459_s26 + $0x20] sm:$0xff]   ;;  %v5529_v49 = vld [vmem:[%s5459_s26 + $0x30] sm:$0xff]   ;;  %v5535_v52 = vld [vmem:[%s5459_s26 + $0x38] sm:$0xff]  }
  0x19   : > { %v1805_v23 = vsel %vm1802_vm2, %v1803_v17, %v1804_v13  ;;  %v319_v29 = vrot.slane %v317_v20, 1  ;;  %v1810_v36 = vrot.slane %v5502_v30, 2  ;;  %v329_v37 = vshrl.u32 %v5495_v27, 16  ;;  %v5541_v55 = vld [vmem:[%s5459_s26 + $0x28] sm:$0xff]   ;;  %v5545_v57 = vld [vmem:[%s5459_s26 + $0x30] sm:$0xff]   ;;  %v5552_v62 = vld [vmem:[%s5459_s26 + $0x40] sm:$0xff]  }
  0x1a   : > { %4657 = vmatprep.mubr.msk.bf16.mxu0 %vm457_vm1, %v1805_v23  ;;  %v314_v31 = vrot.slane %v312_v26, 1  ;;  %v327_v39 = vrot.slane %v325_v32, 1  ;;  %v1809_v40 = vsel %vm1802_vm2, %v1806_v18, %v1808_v33  ;;  %v333_v41 = vshll.u32 %v5508_v34, 16  ;;  %v5561_v5 = vld [vmem:[%s5459_s26 + $0x38] sm:$0xff]   ;;  %v5569_v14 = vld [vmem:[%s5459_s26 + $0x48] sm:$0xff]   ;;  %v5573_v17 = vld [vmem:[%s5459_s26 + $0x40] sm:$0xff]  }
  0x1b   : > { %4658 = vmatmul.mubr.msk.bf16.vlgmr.msra.gmra.mrb[0].mxu0 %vm457_vm1, %v1807_v24  ;;  %v323_v35 = vor.u32 %v321_v21, %v319_v29  ;;  %v337_v43 = vshrl.u32 %v5508_v34, 16  ;;  %v1811_v50 = vsel %vm1802_vm2, %v1808_v33, %v1810_v36  ;;  %v341_v51 = vshll.u32 %v5518_v42, 16  ;;  %v5578_v21 = vld [vmem:[%s5459_s26 + $0x50] sm:$0xff]   ;;  %v5583_v26 = vld [vmem:[%s5459_s26 + $0x48] sm:$0xff]   ;;  %s4043_s13 = sshll.u32 %s7079_s16, 3 }
  0x1c   : > { %4694 = vmatpush3.bf16.msra.mxu0 %v2257_v9  ;;  %v315_v38 = vor.u32 %v314_v31, %v310_v25  ;;  %4661 = vmatprep.mubr.msk.bf16.mxu0 %vm457_vm1, %v1809_v40  ;;  %v331_v47 = vor.u32 %v329_v37, %v327_v39  ;;  %v335_v48 = vrot.slane %v333_v41, 1  ;;  %v1812_v54 = vrot.slane %v5529_v49, 2  ;;  %6950 = vst [vmem:[#allocation2_spill] sm:$0xff] %v5578_v21  ;;  %s6654_s19 = scalar_lea.vmem %s6860_s3, %s4043_s13 }
  0x1d   : > { %5142 = vmatprep.subr.msk.bf16.mxu0 %vm512_vm0, %v5488_v22  ;;  %v328_v46 = vsel %vm308_vm3, %v323_v35, %v327_v39  ;;  %v345_v56 = vshrl.u32 %v5518_v42, 16  ;;  %v343_v59 = vrot.slane %v341_v51, 1  ;;  %v349_v61 = vshll.u32 %v5541_v55, 16 }
  0x1e   : > { %v320_v45 = vsel %vm308_vm3, %v315_v38, %v319_v29  ;;  %v336_v53 = vsel %vm308_vm3, %v331_v47, %v335_v48  ;;  %v339_v58 = vor.u32 %v337_v43, %v335_v48  ;;  %v1813_v60 = vsel %vm1802_vm2, %v1810_v36, %v1812_v54  ;;  %v5592_v36 = vld [vmem:[%s5459_s26 + $0x58] sm:$0xff]  }
  0x1f   : > { %4505 = vmatprep.mubr.msk.bf16.mxu1 %vm457_vm1, %v320_v45  ;;  %v1814_v63 = vrot.slane %v5535_v52, 2  ;;  %v347_v0 = vor.u32 %v345_v56, %v343_v59  ;;  %v351_v2 = vrot.slane %v349_v61, 1  ;;  %v357_v3 = vshll.u32 %v5545_v57, 16  ;;  %6951 = vst [vmem:[#allocation3_spill] sm:$0xff] %v5592_v36  ;;  %v5601_v45 = vld [vmem:[%s5459_s26 + $0x50] sm:$0xff]  }
  0x20   : > { %4506 = vmatmul.mubr.msk.bf16.vlgmr.msra.gmra.mrb[0].mxu1 %vm457_vm1, %v328_v46  ;;  %v1816_v4 = vrot.slane %v5552_v62, 2  ;;  %v344_v6 = vsel %vm308_vm3, %v339_v58, %v343_v59  ;;  %v353_v8 = vshrl.u32 %v5541_v55, 16  ;;  %v361_v9 = vshrl.u32 %v5545_v57, 16 }
  0x21   : > { %4542 = vmatpush3.bf16.msra.mxu1 %v730_v12  ;;  %4509 = vmatprep.mubr.msk.bf16.mxu1 %vm457_vm1, %v336_v53  ;;  %v352_v12 = vsel %vm308_vm3, %v347_v0, %v351_v2  ;;  %v1815_v13 = vsel %vm1802_vm2, %v1812_v54, %v1814_v63  ;;  %v365_v15 = vshll.u32 %v5561_v5, 16  ;;  %v359_v18 = vrot.slane %v357_v3, 1 }
  0x22   : > { %5137 = vmatprep.subr.msk.bf16.mxu1 %vm512_vm0, %v5524_v44  ;;  %v1817_v20 = vsel %vm1802_vm2, %v1814_v63, %v1816_v4  ;;  %v355_v23 = vor.u32 %v353_v8, %v351_v2  ;;  %v1818_v29 = vrot.slane %v5569_v14, 2  ;;  %v373_v31 = vshll.u32 %v5573_v17, 16  ;;  %v5616_v63 = vld [vmem:[%s5459_s26 + $0x58] sm:$0xff]  }
  0x23   : > { %4662 = vmatmul.mubr.msk.bf16.gmra.mrb[4].mxu0 %vm457_vm1, %v1811_v50  ;;  %v363_v24 = vor.u32 %v361_v9, %v359_v18  ;;  %v367_v25 = vrot.slane %v365_v15, 1  ;;  %v369_v32 = vshrl.u32 %v5561_v5, 16  ;;  %v1820_v33 = vrot.slane %v5578_v21, 2 }
  0x24   : > { %4665 = vmatprep.mubr.msk.bf16.mxu0 %vm457_vm1, %v1813_v60  ;;  %v360_v35 = vsel %vm308_vm3, %v355_v23, %v359_v18  ;;  %v6891_v37 = vshrl.u32 %v5463_v7, 16  ;;  %v6890_v38 = vshll.u32 %v5463_v7, 16  ;;  %v2118_v39 = vshrl.u32 %v5467_v10, 16 }
  0x25   : > { %v368_v40 = vsel %vm308_vm3, %v363_v24, %v367_v25  ;;  %v377_v41 = vshrl.u32 %v5573_v17, 16  ;;  %v381_v43 = vshll.u32 %v5583_v26, 16  ;;  %v2121_v46 = vshll.u32 %v5467_v10, 16 }
  0x26   : > { %v1819_v47 = vsel %vm1802_vm2, %v1816_v4, %v1818_v29  ;;  %v375_v48 = vrot.slane %v373_v31, 1  ;;  %v2120_v50 = vrot.slane %v2118_v39, 2  ;;  %v2125_v51 = vrot.slane %v6891_v37, 2  ;;  %v5841_v37 = vld [vmem:[%s5459_s26 + $0x18] sm:$0xf] }
  0x27   : > { %v1821_v53 = vsel %vm1802_vm2, %v1818_v29, %v1820_v33  ;;  %v2123_v54 = vrot.slane %v2121_v46, 3  ;;  %v2126_v56 = vrot.slane %v6890_v38, 3  ;;  %v371_v58 = vor.u32 %v369_v32, %v367_v25  ;;  %6962 = vst [vmem:[#allocation14_spill] sm:$0xff] %v5841_v37 }
  0x28   : > { %4510 = vmatmul.mubr.msk.bf16.gmra.mrb[4].mxu1 %vm457_vm1, %v344_v6  ;;  %v6861_v10 = vrot.slane %v5592_v36, 2  ;;  %v379_v59 = vor.u32 %v377_v41, %v375_v48  ;;  %v383_v60 = vrot.slane %v381_v43, 1  ;;  %v389_v61 = vshll.u32 %v5601_v45, 16  ;;  %v5648_v43 = vld [vmem:[%s5459_s26 + $0x68] sm:$0xff]  }
  0x29   : > { %4513 = vmatprep.mubr.msk.bf16.mxu1 %vm457_vm1, %v352_v12  ;;  %v6889_v0 = vshrl.u32 %v5470_v11, 16  ;;  %v6888_v2 = vshll.u32 %v5470_v11, 16  ;;  %v2124_v3 = vor.u32 %v2123_v54, %v2120_v50  ;;  %v2127_v4 = vor.u32 %v2126_v56, %v2125_v51 }
  0x2a   : > { %v6879_v6 = vshrl.u32 %v5498_v28, 16  ;;  %v6878_v8 = vshll.u32 %v5498_v28, 16  ;;  %v376_v9 = vsel %vm308_vm3, %v371_v58, %v375_v48  ;;  %v385_v12 = vshrl.u32 %v5583_v26, 16 }
  0x2b   : > { %4666 = vmatmul.mubr.msk.bf16.gmra.mrb[8].mxu0 %vm457_vm1, %v1815_v13  ;;  %v384_v13 = vsel %vm308_vm3, %v379_v59, %v383_v60  ;;  %v393_v15 = vshrl.u32 %v5601_v45, 16  ;;  %v397_v18 = vshll.u32 %v5616_v63, 16  ;;  %v1823_v23 = vsel %vm1802_vm2, %v1820_v33, %v6861_v10  ;;  %v5716_v10 = vld [vmem:[%s5459_s26 + $0x88] sm:$0xff]  }
  0x2c   : > { %4669 = vmatprep.mubr.msk.bf16.mxu0 %vm457_vm1, %v1817_v20  ;;  %v5629_v20 = vld [vmem:[%s5459_s26 + $0x60] sm:$0xff]   ;;  %v391_v24 = vrot.slane %v389_v61, 1  ;;  %v2129_v25 = vrot.slane %v6889_v0, 2  ;;  %v2130_v29 = vrot.slane %v6888_v2, 3  ;;  %v2128_v31 = vsel %vm2116_vm4, %v2124_v3, %v2127_v4  ;;  %v2472_v0 = vld [vmem:[%s5459_s26 + $0x10] sm:$0x8] }
  0x2d   : > { %v2133_v32 = vrot.slane %v6879_v6, 2  ;;  %v387_v33 = vor.u32 %v385_v12, %v383_v60  ;;  %v405_v41 = vshll.u32 %v5629_v20, 16  ;;  %v6872_v48 = vshll.u32 %v5502_v30, 16 }
  0x2e   : > { %v395_v39 = vor.u32 %v393_v15, %v391_v24  ;;  %v2131_v46 = vor.u32 %v2130_v29, %v2129_v25  ;;  %v6871_v51 = vshrl.u32 %v5529_v49, 16  ;;  %v401_v56 = vshrl.u32 %v5616_v63, 16  ;;  %v5668_v15 = vld [vmem:[%s5459_s26 + $0x70] sm:$0xff]  }
  0x2f   : > { %v392_v54 = vsel %vm308_vm3, %v387_v33, %v391_v24  ;;  %v2697_v58 = vsel %vm512_vm0, %v5488_v22, 0  ;;  %v409_v60 = vshrl.u32 %v5629_v20, 16  ;;  %v413_v61 = vshll.u32 %v5648_v43, 16  ;;  %v5680_v24 = vld [vmem:[%s6858_s1 + $0x1c] sm:$0xf] }
  0x30   : > { %4514 = vmatmul.mubr.msk.bf16.gmra.mrb[8].mxu1 %vm457_vm1, %v360_v35  ;;  %v2134_v35 = vrot.slane %v6878_v8, 3  ;;  %v2132_v3 = vsel %vm2116_vm4, %v2127_v4, %v2131_v46  ;;  %v6863_v33 = vshll.u32 %v5535_v52, 16  ;;  %v5801_v8 = vld [vmem:[%s5459_s26 + $0x88] sm:$0xff]  }
  0x31   : > { %4517 = vmatprep.mubr.msk.bf16.mxu1 %vm457_vm1, %v368_v40  ;;  %v399_v40 = vrot.slane %v397_v18, 1  ;;  %v2141_v18 = vrot.slane %v6871_v51, 2  ;;  %v415_v29 = vrot.slane %v413_v61, 1  ;;  %v5777_v51 = vld [vmem:[%s5459_s26 + $0x78] sm:$0xff]   ;;  %6959 = vst [vmem:[#allocation11_spill] sm:$0xff] %v5801_v8 }
  0x32   : > { %v2135_v50 = vor.u32 %v2134_v35, %v2133_v32  ;;  %v6869_v35 = vshrl.u32 %v5535_v52, 16  ;;  %6957 = vst [vmem:[#allocation9_spill] sm:$0xff] %v5777_v51 }
  0x33   : > { %4670 = vmatmul.mubr.msk.bf16.gmra.mrb[12].mxu0 %vm457_vm1, %v1819_v47  ;;  %v6877_v47 = vshrl.u32 %v5502_v30, 16  ;;  %v400_v59 = vsel %vm308_vm3, %v395_v39, %v399_v40  ;;  %v403_v4 = vor.u32 %v401_v56, %v399_v40  ;;  %v421_v39 = vshll.u32 %v5668_v15, 16 }
  0x34   : > { %4673 = vmatprep.mubr.msk.bf16.mxu0 %vm457_vm1, %v1821_v53  ;;  %v6870_v53 = vshll.u32 %v5529_v49, 16  ;;  %v2136_v22 = vsel %vm2116_vm4, %v2131_v46, %v2135_v50  ;;  %v6865_v46 = vshll.u32 %v5552_v62, 16  ;;  %v417_v56 = vshrl.u32 %v5648_v43, 16 }
  0x35   : > { %v2137_v12 = vrot.slane %v6877_v47, 2 }
  0x38   : > { %4518 = vmatmul.mubr.msk.bf16.gmra.mrb[12].mxu1 %vm457_vm1, %v376_v9  ;;  %v407_v9 = vrot.slane %v405_v41, 1  ;;  %v6862_v41 = vshrl.u32 %v5552_v62, 16 }
  0x39   : > { %4521 = vmatprep.mubr.msk.bf16.mxu1 %vm457_vm1, %v384_v13  ;;  %v2138_v13 = vrot.slane %v6872_v48, 3  ;;  %v5786_v48 = vld [vmem:[%s5459_s26 + $0x80] sm:$0xff]  }
  0x3a   : > { %v411_v25 = vor.u32 %v409_v60, %v407_v9  ;;  %6958 = vst [vmem:[#allocation10_spill] sm:$0xff] %v5786_v48 }
  0x3b   : > { %4674 = vmatmul.mubr.msk.bf16.gmra.mrb[16].mxu0 %vm457_vm1, %v1823_v23  ;;  %v2142_v23 = vrot.slane %v6870_v53, 3  ;;  %v2139_v32 = vor.u32 %v2138_v13, %v2137_v12  ;;  %v2146_v12 = vrot.slane %v6863_v33, 3  ;;  %v5769_v53 = vld [vmem:[%s5459_s26 + $0x70] sm:$0xff]  }
  0x3c   : > { %4695 = vmatprep.mubr.msk.bf16.mxu0 %vm457_vm1, %v2128_v31  ;;  %v5684_v31 = vld [vmem:[%s5459_s26 + $0x78] sm:$0xff]   ;;  %6956 = vst [vmem:[#allocation8_spill] sm:$0xff] %v5769_v53 }
  0x3d   : > { %v2143_v40 = vor.u32 %v2142_v23, %v2141_v18  ;;  %v429_v60 = vshll.u32 %v5684_v31, 16  ;;  %v2140_v61 = vsel %vm2116_vm4, %v2135_v50, %v2139_v32  ;;  %v2149_v18 = vrot.slane %v6862_v41, 2 }
  0x3e   : > { %v2150_v23 = vrot.slane %v6865_v46, 3  ;;  %v419_v50 = vor.u32 %v417_v56, %v415_v29  ;;  %v5745_v46 = vld [vmem:[%s5459_s26 + $0x90] ss:$0 sps:$4 sm:$0x11]  }
  0x3f   : > { %v2144_v13 = vsel %vm2116_vm4, %v2139_v32, %v2143_v40 }
  0x40   : > { %4522 = vmatmul.mubr.msk.bf16.gmra.mrb[16].mxu1 %vm457_vm1, %v392_v54  ;;  %v408_v54 = vsel %vm308_vm3, %v403_v4, %v407_v9  ;;  %v423_v9 = vrot.slane %v421_v39, 1  ;;  %v6864_v39 = vshrl.u32 %v5569_v14, 16  ;;  %v2151_v33 = vor.u32 %v2150_v23, %v2149_v18 }
  0x41   : > { %4525 = vmatprep.mubr.msk.bf16.mxu1 %vm457_vm1, %v400_v59  ;;  %v425_v59 = vshrl.u32 %v5668_v15, 16 }
  0x42   : > { %v424_v56 = vsel %vm308_vm3, %v419_v50, %v423_v9 }
  0x43   : > { %4696 = vmatmul.mubr.msk.bf16.vlgmr.msra.gmra.mrb[0].mxu0 %vm457_vm1, %v2132_v3  ;;  %v2145_v3 = vrot.slane %v6869_v35, 2  ;;  %v427_v4 = vor.u32 %v425_v59, %v423_v9  ;;  %v433_v59 = vshrl.u32 %v5684_v31, 16  ;;  %v5766_v35 = vld [vmem:[%s5459_s26 + $0x68] sm:$0xff]  }
  0x44   : > { %4732 = vmatpush3.bf16.msra.mxu0 %v2697_v58  ;;  %4699 = vmatprep.mubr.msk.bf16.mxu0 %vm457_vm1, %v2136_v22  ;;  %v416_v58 = vsel %vm308_vm3, %v411_v25, %v415_v29  ;;  %v5707_v22 = vld [vmem:[%s5459_s26 + $0x80] sm:$0xff]   ;;  %v431_v25 = vrot.slane %v429_v60, 1  ;;  %v6867_v29 = vshll.u32 %v5578_v21, 16  ;;  %6955 = vst [vmem:[#allocation7_spill] sm:$0xff] %v5766_v35 }
  0x45   : > { %5143 = vmatprep.subr.msk.bf16.mxu0 %vm512_vm0, %v5680_v24  ;;  %v2147_v32 = vor.u32 %v2146_v12, %v2145_v3  ;;  %v437_v41 = vshll.u32 %v5707_v22, 16  ;;  %v445_v3 = vshll.u32 %v5716_v10, 16 }
  0x46   : > { %v432_v60 = vsel %vm308_vm3, %v427_v4, %v431_v25  ;;  %v2158_v4 = vrot.slane %v6867_v29, 3  ;;  %v6874_v29 = vshll.u32 %v5592_v36, 16 }
  0x47   : > { %v2148_v12 = vsel %vm2116_vm4, %v2143_v40, %v2147_v32  ;;  %v439_v9 = vrot.slane %v437_v41, 1  ;;  %v2152_v23 = vsel %vm2116_vm4, %v2147_v32, %v2151_v33  ;;  %v5741_v40 = vld [vmem:[%s5459_s26 + $0x60] sm:$0xff]   ;;  %v447_v41 = vrot.slane %v445_v3, 1 }
  0x48   : > { %4526 = vmatmul.mubr.msk.bf16.gmra.mrb[20].mxu1 %vm457_vm1, %v408_v54  ;;  %v6868_v54 = vshll.u32 %v5569_v14, 16  ;;  %6952 = vst [vmem:[#allocation4_spill] sm:$0xff] %v5741_v40  ;;  %v2162_v3 = vrot.slane %v6874_v29, 3  ;;  %v6880_v29 = vshrl.u32 %v5766_v35, 16 }
  0x49   : > { %4529 = vmatprep.mubr.msk.bf16.mxu1 %vm457_vm1, %v416_v58  ;;  %v6866_v58 = vshrl.u32 %v5578_v21, 16 }
  0x4a   : > { %v2154_v18 = vrot.slane %v6868_v54, 3  ;;  %v5752_v54 = vld [vmem:[%s5459_s26 + $0x1c] sm:$0xf]  ;;  %v2169_v6 = vrot.slane %v6880_v29, 2 }
  0x4b   : > { %4700 = vmatmul.mubr.msk.bf16.gmra.mrb[4].mxu0 %vm457_vm1, %v2140_v61  ;;  %v441_v61 = vshrl.u32 %v5707_v22, 16  ;;  %v2157_v50 = vrot.slane %v6866_v58, 2  ;;  %v6873_v58 = vshrl.u32 %v5592_v36, 16  ;;  %6953 = vst [vmem:[#allocation5_spill] sm:$0xff] %v5752_v54 }
  0x4c   : > { %4703 = vmatprep.mubr.msk.bf16.mxu0 %vm457_vm1, %v2144_v13  ;;  %v2153_v13 = vrot.slane %v6864_v39, 2  ;;  %v435_v39 = vor.u32 %v433_v59, %v431_v25  ;;  %v6875_v59 = vshrl.u32 %v5741_v40, 16  ;;  %v5191_v29 = vld [vmem:[%s5459_s26 + $0x98] ss:$0 sps:$4 sm:$0x77]  }
  0x4d   : > { %v2159_v25 = vor.u32 %v2158_v4, %v2157_v50  ;;  %v2161_v4 = vrot.slane %v6873_v58, 2  ;;  %v2194_v2 = vshrl.u32 %v5191_v29, 16 }
  0x4e   : > { %v2155_v32 = vor.u32 %v2154_v18, %v2153_v13  ;;  %v449_v13 = vshrl.u32 %v5716_v10, 16  ;;  %v453_v18 = vshll.u32 %v5745_v46, 16 }
  0x50   : > { %4530 = vmatmul.mubr.msk.bf16.gmra.mrb[24].mxu1 %vm457_vm1, %v424_v56  ;;  %v443_v56 = vor.u32 %v441_v61, %v439_v9  ;;  %v6876_v61 = vshll.u32 %v5741_v40, 16  ;;  %v2156_v50 = vsel %vm2116_vm4, %v2151_v33, %v2155_v32  ;;  %v451_v33 = vor.u32 %v449_v13, %v447_v41 }
  0x51   : > { %4533 = vmatprep.mubr.msk.bf16.mxu1 %vm457_vm1, %v432_v60  ;;  %v5755_v60 = vld [vmem:[%s5459_s26 + $0x20] sm:$0xf]  ;;  %v455_v58 = vrot.slane %v453_v18, 1  ;;  %v6886_v18 = vshrl.u32 %v5786_v48, 16 }
  0x52   : > { %6954 = vst [vmem:[#allocation6_spill] sm:$0xff] %v5755_v60 }
  0x53   : > { %4704 = vmatmul.mubr.msk.bf16.gmra.mrb[8].mxu0 %vm457_vm1, %v2148_v12  ;;  %v440_v12 = vsel %vm308_vm3, %v435_v39, %v439_v9  ;;  %v2160_v39 = vsel %vm2116_vm4, %v2155_v32, %v2159_v25  ;;  %v2165_v9 = vrot.slane %v6875_v59, 2  ;;  %v6881_v32 = vshrl.u32 %v5769_v53, 16 }
  0x54   : > { %4707 = vmatprep.mubr.msk.bf16.mxu0 %vm457_vm1, %v2152_v23  ;;  %v448_v23 = vsel %vm308_vm3, %v443_v56, %v447_v41  ;;  %v2166_v56 = vrot.slane %v6876_v61, 3  ;;  %v6882_v59 = vshll.u32 %v5769_v53, 16  ;;  %v2163_v61 = vor.u32 %v2162_v3, %v2161_v4 }
  0x55   : > { %v6884_v41 = vshll.u32 %v5777_v51, 16  ;;  %v456_v47 = vsel %vm308_vm3, %v451_v33, %v455_v58  ;;  %v2173_v4 = vrot.slane %v6881_v32, 2 }
  0x56   : > { %v2167_v13 = vor.u32 %v2166_v56, %v2165_v9  ;;  %v5812_v9 = vld [vmem:[%s5459_s26 + $0x90] sm:$0xff]   ;;  %v2164_v56 = vsel %vm2116_vm4, %v2159_v25, %v2163_v61 }
  0x57   : > { %6960 = vst [vmem:[#allocation12_spill] sm:$0xff] %v5812_v9  ;;  %v2178_v33 = vrot.slane %v6884_v41, 3  ;;  %v6892_v41 = vshll.u32 %v5801_v8, 16 }
  0x58   : > { %4534 = vmatmul.mubr.msk.bf16.gmra.mrb[28].mxu1 %vm457_vm1, %v440_v12  ;;  %v6885_v12 = vshll.u32 %v5766_v35, 16  ;;  %v2168_v32 = vsel %vm2116_vm4, %v2163_v61, %v2167_v13  ;;  %v6894_v61 = vshrl.u32 %v5812_v9, 16 }
  0x59   : > { %4537 = vmatprep.mubr.msk.bf16.mxu1 %vm457_vm1, %v448_v23  ;;  %v6883_v23 = vshrl.u32 %v5777_v51, 16 }
  0x5a   : > { %v2170_v3 = vrot.slane %v6885_v12, 3 }
  0x5b   : > { %4708 = vmatmul.mubr.msk.bf16.gmra.mrb[12].mxu0 %vm457_vm1, %v2156_v50  ;;  %v6887_v50 = vshll.u32 %v5786_v48, 16  ;;  %v2177_v58 = vrot.slane %v6883_v23, 2  ;;  %v6895_v23 = vshrl.u32 %v5801_v8, 16 }
  0x5c   : > { %4711 = vmatprep.mubr.msk.bf16.mxu0 %vm457_vm1, %v2160_v39  ;;  %v2174_v39 = vrot.slane %v6882_v59, 3  ;;  %v2181_v59 = vrot.slane %v6886_v18, 2 }
  0x5d   : > { %v2182_v25 = vrot.slane %v6887_v50, 3  ;;  %v2179_v18 = vor.u32 %v2178_v33, %v2177_v58  ;;  %v6893_v50 = vshll.u32 %v5812_v9, 16  ;;  %v2189_v58 = vrot.slane %v6894_v61, 2  ;;  %v5860_v33 = vld [vmem:[%s5459_s26 + $0x28] sm:$0xf] }
  0x5e   : > { %v2175_v12 = vor.u32 %v2174_v39, %v2173_v4  ;;  %v2197_v4 = vshll.u32 %v5191_v29, 16  ;;  %v5850_v39 = vld [vmem:[%s5459_s26 + $0x24] sm:$0xf]  ;;  %6964 = vst [vmem:[#allocation16_spill] sm:$0xff] %v5860_v33  ;;  %v5895_v61 = vld [vmem:[%s5459_s26 + $0x34] sm:$0xf] }
  0x5f   : > { %v5838_v38 = vor.u32 %v2182_v25, %v2181_v59  ;;  %6963 = vst [vmem:[#allocation15_spill] sm:$0xff] %v5850_v39  ;;  %v2190_v29 = vrot.slane %v6893_v50, 3  ;;  %v5892_v50 = vld [vmem:[%s5459_s26 + $0x30] sm:$0xf]  ;;  %6967 = vst [vmem:[#allocation19_spill] sm:$0xff] %v5895_v61 }
  0x60   : > { %4538 = vmatmul.mubr.msk.bf16.gmra.mrb[32].mxu1 %vm457_vm1, %v456_v47  ;;  %v2171_v47 = vor.u32 %v2170_v3, %v2169_v6  ;;  %v1008_v6 = vsel %vm512_vm0, %v5524_v44, 0  ;;  %v2185_v3 = vrot.slane %v6895_v23, 2  ;;  %v5863_v25 = vsel %vm2116_vm4, %v2175_v12, %v2179_v18  ;;  %6966 = vst [vmem:[#allocation18_spill] sm:$0xff] %v5892_v50 }
  0x61   : > { %4543 = vmatprep.mubr.msk.bf16.mxu1 %vm457_vm1, %v5481_v19  ;;  %v5836_v19 = vld [vmem:[%s5459_s26 + $0x14] sm:$0xf]  ;;  %v5925_v35 = vor.u32 %v2190_v29, %v2189_v58 }
  0x62   : > { %6961 = vst [vmem:[#allocation13_spill] sm:$0xff] %v5836_v19  ;;  %v2172_v59 = vsel %vm2116_vm4, %v2167_v13, %v2171_v47  ;;  %v5857_v44 = vcombine.low %v2472_v0, %v5836_v19  ;;  %v5871_v13 = vcombine.low %v5841_v37, %v5752_v54  ;;  %v5879_v0 = vld [vmem:[%s6858_s1 + $0xc] sm:$0xf] }
  0x63   : > { %4712 = vmatmul.mubr.msk.bf16.gmra.mrb[16].mxu0 %vm457_vm1, %v2164_v56  ;;  %v2176_v56 = vsel %vm2116_vm4, %v2171_v47, %v2175_v12  ;;  %v5874_v47 = vld [vmem:[%s5459_s26 + $0x2c] sm:$0xf]  ;;  %v5885_v12 = vsel %vm2116_vm4, %v2179_v18, %v5838_v38  ;;  %v5901_v18 = vrot.slane %v2197_v4, 3  ;;  %v5920_v4 = vld [vmem:[%s5459_s26 + $0x38] sm:$0xf] }
  0x64   : > { %4715 = vmatprep.mubr.msk.bf16.mxu0 %vm457_vm1, %v2168_v32  ;;  %v2186_v32 = vrot.slane %v6892_v41, 3  ;;  %v5867_v41 = vrot.slane %v2194_v2, 2  ;;  %6965 = vst [vmem:[#allocation17_spill] sm:$0xff] %v5874_v47  ;;  %v5889_v2 = vcombine.low %v5755_v60, %v5850_v39  ;;  %v2920_v23 = vshrl.u32 %v5857_v44, 16  ;;  %6968 = vst [vmem:[#allocation20_spill] sm:$0xff] %v5920_v4 }
  0x65   : > { %v2923_v9 = vshll.u32 %v5857_v44, 16  ;;  %v2928_v8 = vshrl.u32 %v5871_v13, 16  ;;  %v2931_v48 = vshll.u32 %v5871_v13, 16 }
  0x66   : > { %v2922_v51 = vrot.slane %v2920_v23, 3 }
  0x67   : > { %v2925_v60 = vrot.slane %v2923_v9, 4  ;;  %v2930_v23 = vrot.slane %v2928_v8, 3  ;;  %v5923_v9 = vld [vmem:[%s5459_s26 + $0x3c] sm:$0xf] }
  0x68   : > { %4544 = vmatmul.mubr.msk.bf16.vlgmr.msra.gmra.mrb[0].mxu1 %vm457_vm1, %v5477_v16  ;;  %v2187_v16 = vor.u32 %v2186_v32, %v2185_v3  ;;  %v5913_v3 = vcombine.low %v5860_v33, %v5874_v47  ;;  %v5917_v32 = vcombine.low %v5892_v50, %v5895_v61  ;;  %6969 = vst [vmem:[#allocation21_spill] sm:$0xff] %v5923_v9  ;;  %v5931_v47 = vld [vmem:[%s5459_s26 + $0x44] sm:$0xf] }
  0x69   : > { %4580 = vmatpush3.bf16.msra.mxu1 %v1008_v6  ;;  %4547 = vmatprep.mubr.msk.bf16.mxu1 %vm457_vm1, %v5495_v27  ;;  %v2937_v6 = vshrl.u32 %v5889_v2, 16  ;;  %v2940_v27 = vshll.u32 %v5889_v2, 16  ;;  %v2926_v54 = vor.u32 %v2925_v60, %v2922_v51  ;;  %6971 = vst [vmem:[#allocation23_spill] sm:$0xff] %v5931_v47  ;;  %v5940_v58 = vcombine.low %v5920_v4, %v5923_v9 }
  0x6a   : > { %5138 = vmatprep.subr.msk.bf16.mxu1 %vm512_vm0, %v5879_v0  ;;  %v2946_v50 = vshrl.u32 %v5913_v3, 16  ;;  %v2949_v8 = vshll.u32 %v5913_v3, 16  ;;  %v2955_v51 = vshrl.u32 %v5917_v32, 16  ;;  %v2958_v60 = vshll.u32 %v5917_v32, 16 }
  0x6b   : > { %4716 = vmatmul.mubr.msk.bf16.gmra.mrb[20].mxu0 %vm457_vm1, %v2172_v59  ;;  %v2933_v59 = vrot.slane %v2931_v48, 4  ;;  %v2939_v39 = vrot.slane %v2937_v6, 3  ;;  %v2942_v53 = vrot.slane %v2940_v27, 4  ;;  %v2964_v9 = vshrl.u32 %v5940_v58, 16 }
  0x6c   : > { %4719 = vmatprep.mubr.msk.bf16.mxu0 %vm457_vm1, %v2176_v56  ;;  %v5928_v56 = vld [vmem:[%s5459_s26 + $0x40] sm:$0xf]  ;;  %v2948_v6 = vrot.slane %v2946_v50, 3  ;;  %v2951_v27 = vrot.slane %v2949_v8, 4  ;;  %v2960_v48 = vrot.slane %v2958_v60, 4 }
  0x6d   : > { %6970 = vst [vmem:[#allocation22_spill] sm:$0xff] %v5928_v56  ;;  %v2934_v61 = vor.u32 %v2933_v59, %v2930_v23  ;;  %v2943_v33 = vor.u32 %v2942_v53, %v2939_v39  ;;  %v5949_v53 = vcombine.low %v5928_v56, %v5931_v47  ;;  %v5952_v39 = vld [vmem:[%s5459_s26 + $0x48] sm:$0xf]  ;;  %v5955_v23 = vld [vmem:[%s5459_s26 + $0x4c] sm:$0xf]  ;;  %v2966_v19 = vrot.slane %v2964_v9, 3 }
  0x6e   : > { %6972 = vst [vmem:[#allocation24_spill] sm:$0xff] %v5952_v39  ;;  %6973 = vst [vmem:[#allocation25_spill] sm:$0xff] %v5955_v23  ;;  %v5965_v50 = vld [vmem:[%s5459_s26 + $0x50] sm:$0xf]  ;;  %v5968_v8 = vld [vmem:[%s5459_s26 + $0x54] sm:$0xf]  ;;  %v2952_v47 = vor.u32 %v2951_v27, %v2948_v6  ;;  %v5988_v6 = vcombine.low %v5952_v39, %v5955_v23 }
  0x6f   : > { %v5943_v29 = vsel %vm2918_vm5, %v2926_v54, %v2934_v61  ;;  %v5958_v59 = vsel %vm2918_vm5, %v2934_v61, %v2943_v33  ;;  %v2957_v54 = vrot.slane %v2955_v51, 3  ;;  %6974 = vst [vmem:[#allocation26_spill] sm:$0xff] %v5965_v50  ;;  %6975 = vst [vmem:[#allocation27_spill] sm:$0xff] %v5968_v8  ;;  %v2967_v61 = vshll.u32 %v5940_v58, 16  ;;  %v5977_v51 = vld [vmem:[%s5459_s26 + $0x58] sm:$0xf] }
  0x70   : > { %4548 = vmatmul.mubr.msk.bf16.gmra.mrb[4].mxu1 %vm457_vm1, %v5508_v34  ;;  %v2188_v34 = vsel %vm2116_vm4, %v5838_v38, %v2187_v16  ;;  %6976 = vst [vmem:[#allocation28_spill] sm:$0xff] %v5977_v51  ;;  %v5980_v60 = vld [vmem:[%s5459_s26 + $0x5c] sm:$0xf]  ;;  %v2973_v56 = vshrl.u32 %v5949_v53, 16  ;;  %v2976_v4 = vshll.u32 %v5949_v53, 16  ;;  %v2982_v36 = vshrl.u32 %v5988_v6, 16 }
  0x71   : > { %4551 = vmatprep.mubr.msk.bf16.mxu1 %vm457_vm1, %v5518_v42  ;;  %v2192_v42 = vsel %vm2116_vm4, %v2187_v16, %v5925_v35  ;;  %6977 = vst [vmem:[#allocation29_spill] sm:$0xff] %v5980_v60  ;;  %v2961_v38 = vor.u32 %v2960_v48, %v2957_v54  ;;  %v5994_v27 = vld [vmem:[%s5459_s26 + $0x64] sm:$0xf]  ;;  %v5997_v16 = vsel %vm2918_vm5, %v2943_v33, %v2952_v47  ;;  %v2969_v48 = vrot.slane %v2967_v61, 4 }
  0x72   : > { %6979 = vst [vmem:[#allocation31_spill] sm:$0xff] %v5994_v27  ;;  %v6001_v54 = vcombine.low %v5965_v50, %v5968_v8  ;;  %v2978_v40 = vrot.slane %v2976_v4, 4  ;;  %v6008_v23 = vcombine.low %v5977_v51, %v5980_v60  ;;  %v2985_v33 = vshll.u32 %v5988_v6, 16 }
  0x73   : > { %4720 = vmatmul.mubr.msk.bf16.gmra.mrb[24].mxu0 %vm457_vm1, %v5863_v25  ;;  %v5991_v25 = vld [vmem:[%s5459_s26 + $0x60] sm:$0xf]  ;;  %v6004_v37 = vsel %vm2918_vm5, %v2952_v47, %v2961_v38  ;;  %v2970_v39 = vor.u32 %v2969_v48, %v2966_v19  ;;  %v6930_v48 = vrot.slane %v5716_v10, 1  ;;  %v951_v60 = vrot.slane %v5745_v46, 1 }
  0x74   : > { %4723 = vmatprep.mubr.msk.bf16.mxu0 %vm457_vm1, %v5885_v12  ;;  %6978 = vst [vmem:[#allocation30_spill] sm:$0xff] %v5991_v25  ;;  %v2975_v12 = vrot.slane %v2973_v56, 3  ;;  %v6014_v9 = vcombine.low %v5991_v25, %v5994_v27  ;;  %v2991_v8 = vshrl.u32 %v6001_v54, 16  ;;  %v2994_v47 = vshll.u32 %v6001_v54, 16 }
  0x75   : > { %v6019_v4 = vsel %vm2918_vm5, %v2961_v38, %v2970_v39  ;;  %v2984_v56 = vrot.slane %v2982_v36, 3  ;;  %v2987_v19 = vrot.slane %v2985_v33, 4  ;;  %v3000_v38 = vshrl.u32 %v6008_v23, 16 }
  0x76   : > { %v2979_v61 = vor.u32 %v2978_v40, %v2975_v12  ;;  %v2993_v40 = vrot.slane %v2991_v8, 3  ;;  %v2996_v12 = vrot.slane %v2994_v47, 4  ;;  %v3003_v33 = vshll.u32 %v6008_v23, 16 }
  0x77   : > { %v2988_v36 = vor.u32 %v2987_v19, %v2984_v56  ;;  %v6042_v46 = vsel %vm915_vm6, %v6930_v48, %v951_v60  ;;  %v3012_v47 = vshll.u32 %v6014_v9, 16  ;;  %v2200_v56 = vor.u32 %v5901_v18, %v5867_v41  ;;  %v6053_v19 = vld [vmem:[%s5459_s26 + $0x74] sm:$0xf] }
  0x78   : > { %4552 = vmatmul.mubr.msk.bf16.gmra.mrb[8].mxu1 %vm457_vm1, %v5541_v55  ;;  %v6025_v27 = vsel %vm2918_vm5, %v2970_v39, %v2979_v61  ;;  %v6034_v55 = vld [vmem:[%s5459_s26 + $0x68] sm:$0xf]  ;;  %v6037_v39 = vld [vmem:[%s5459_s26 + $0x6c] sm:$0xf]  ;;  %v2997_v8 = vor.u32 %v2996_v12, %v2993_v40  ;;  %6983 = vst [vmem:[#allocation35_spill] sm:$0xff] %v6053_v19  ;;  %v3002_v60 = vrot.slane %v3000_v38, 3 }
  0x79   : > { %4555 = vmatprep.mubr.msk.bf16.mxu1 %vm457_vm1, %v5545_v57  ;;  %6980 = vst [vmem:[#allocation32_spill] sm:$0xff] %v6034_v55  ;;  %6981 = vst [vmem:[#allocation33_spill] sm:$0xff] %v6037_v39  ;;  %v3009_v57 = vshrl.u32 %v6014_v9, 16  ;;  %v6056_v40 = vsel %vm2918_vm5, %v2979_v61, %v2988_v36  ;;  %v3005_v12 = vrot.slane %v3003_v33, 4  ;;  %v2606_v48 = vrot.slane %v5871_v13, 3 }
  0x7a   : > { %v6060_v25 = vsel %vm2918_vm5, %v2988_v36, %v2997_v8  ;;  %v3014_v41 = vrot.slane %v3012_v47, 4  ;;  %v6064_v18 = vcombine.low %v6034_v55, %v6037_v39  ;;  %v2201_v13 = vsel %vm2116_vm4, %v5925_v35, %v2200_v56  ;;  %v6073_v33 = vld [vmem:[%s5459_s26 + $0x78] sm:$0xf]  ;;  %v6076_v36 = vld [vmem:[%s5459_s26 + $0x7c] sm:$0xf] }
  0x7b   : > { %4724 = vmatmul.mubr.msk.bf16.gmra.mrb[28].mxu0 %vm457_vm1, %v2188_v34  ;;  %v6050_v34 = vld [vmem:[%s5459_s26 + $0x70] sm:$0xf]  ;;  %v3006_v51 = vor.u32 %v3005_v12, %v3002_v60  ;;  %6984 = vst [vmem:[#allocation36_spill] sm:$0xff] %v6073_v33  ;;  %6985 = vst [vmem:[#allocation37_spill] sm:$0xff] %v6076_v36  ;;  %v6986_v60 = vrot.slane %v5857_v44, 3 }
  0x7c   : > { %4727 = vmatprep.mubr.msk.bf16.mxu0 %vm457_vm1, %v2192_v42  ;;  %6982 = vst [vmem:[#allocation34_spill] sm:$0xff] %v6050_v34  ;;  %v3011_v42 = vrot.slane %v3009_v57, 3  ;;  %v6068_v61 = vcombine.low %v6050_v34, %v6053_v19  ;;  %v3018_v47 = vshrl.u32 %v6064_v18, 16  ;;  %v2610_v34 = vrot.slane %v5913_v3, 3  ;;  %v6114_v55 = vld [vmem:[%s5459_s26 + $0x88] sm:$0xf] }
  0x7d   : > { %v6079_v57 = vsel %vm2918_vm5, %v2997_v8, %v3006_v51  ;;  %v2607_v12 = vsel %vm2604_vm7, %v6986_v60, %v2606_v48  ;;  %v3021_v8 = vshll.u32 %v6064_v18, 16  ;;  %v2608_v60 = vrot.slane %v5889_v2, 3  ;;  %6989 = vst [vmem:[#allocation40_spill] sm:$0xff] %v6114_v55 }
  0x7e   : > { %v3015_v38 = vor.u32 %v3014_v41, %v3011_v42  ;;  %v6088_v42 = vld [vmem:[%s5459_s26 + $0x80] sm:$0xf]  ;;  %v6091_v41 = vld [vmem:[%s5459_s26 + $0x84] sm:$0xf]  ;;  %v3027_v56 = vshrl.u32 %v6068_v61, 16  ;;  %v3030_v44 = vshll.u32 %v6068_v61, 16 }
  0x7f   : > { %6987 = vst [vmem:[#allocation38_spill] sm:$0xff] %v6088_v42  ;;  %6988 = vst [vmem:[#allocation39_spill] sm:$0xff] %v6091_v41  ;;  %v3023_v19 = vrot.slane %v3021_v8, 4  ;;  %v6122_v8 = vld [vmem:[%s5459_s26 + $0x90] sm:$0xf] }
  0x80   : > { %4556 = vmatmul.mubr.msk.bf16.gmra.mrb[12].mxu1 %vm457_vm1, %v5561_v5  ;;  %v6094_v35 = vsel %vm2918_vm5, %v3006_v51, %v3015_v38  ;;  %v3020_v5 = vrot.slane %v3018_v47, 3  ;;  %v6105_v51 = vcombine.low %v6073_v33, %v6076_v36  ;;  %v3029_v39 = vrot.slane %v3027_v56, 3  ;;  %6991 = vst [vmem:[#allocation42_spill] sm:$0xff] %v6122_v8  ;;  %v6125_v56 = vld [vmem:[%s5459_s26 + $0x94] sm:$0xf] }
  0x81   : > { %4559 = vmatprep.mubr.msk.bf16.mxu1 %vm457_vm1, %v5573_v17  ;;  %v6111_v17 = vcombine.low %v6088_v42, %v6091_v41  ;;  %v3032_v47 = vrot.slane %v3030_v44, 4  ;;  %6992 = vst [vmem:[#allocation43_spill] sm:$0xff] %v6125_v56  ;;  %v2609_v44 = vsel %vm2604_vm7, %v2606_v48, %v2608_v60  ;;  %v3144_v48 = vsel %vm512_vm0, %v5680_v24, 0 }
  0x82   : > { %v3024_v2 = vor.u32 %v3023_v19, %v3020_v5  ;;  %v3036_v50 = vshrl.u32 %v6105_v51, 16  ;;  %v3039_v36 = vshll.u32 %v6105_v51, 16 }
  0x83   : > { %4728 = vmatmul.mubr.msk.bf16.gmra.mrb[32].mxu0 %vm457_vm1, %v2201_v13  ;;  %v6117_v13 = vld [vmem:[%s5459_s26 + $0x8c] sm:$0xf]  ;;  %v3033_v3 = vor.u32 %v3032_v47, %v3029_v39  ;;  %v3048_v41 = vshll.u32 %v6111_v17, 16 }
  0x84   : > { %4733 = vmatprep.mubr.msk.bf16.mxu0 %vm457_vm1, %v2607_v12  ;;  %6990 = vst [vmem:[#allocation41_spill] sm:$0xff] %v6117_v13  ;;  %v3045_v12 = vshrl.u32 %v6111_v17, 16  ;;  %v6131_v42 = vsel %vm2918_vm5, %v3015_v38, %v3024_v2  ;;  %v3038_v19 = vrot.slane %v3036_v50, 3  ;;  %v3041_v5 = vrot.slane %v3039_v36, 4  ;;  %v6150_v36 = vld [vmem:[%s5459_s26 + $0x98] sm:$0xf] }
  0x85   : > { %v6135_v33 = vcombine.low %v6114_v55, %v6117_v13  ;;  %v6138_v21 = vsel %vm2918_vm5, %v3024_v2, %v3033_v3  ;;  %v3050_v47 = vrot.slane %v3048_v41, 4  ;;  %v2611_v38 = vsel %vm2604_vm7, %v2608_v60, %v2610_v34  ;;  %v6155_v2 = vld [vmem:[%s5459_s26 + $0x9c] sm:$0xf]  ;;  %v6183_v55 = vld [vmem:[%s5459_s26 + $0xa0] sm:$0xf] }
  0x86   : > { %v3047_v39 = vrot.slane %v3045_v12, 3  ;;  %v6147_v50 = vcombine.low %v6122_v8, %v6125_v56  ;;  %v3042_v13 = vor.u32 %v3041_v5, %v3038_v19  ;;  %6993 = vst [vmem:[#allocation44_spill] sm:$0xff] %v6155_v2  ;;  %v2612_v5 = vrot.slane %v5917_v32, 3  ;;  %6994 = vst [vmem:[#allocation45_spill] sm:$0xff] %v6183_v55 }
  0x87   : > { %v3054_v41 = vshrl.u32 %v6135_v33, 16  ;;  %v3057_v60 = vshll.u32 %v6135_v33, 16  ;;  %v2614_v8 = vrot.slane %v5940_v58, 3 }
  0x88   : > { %4560 = vmatmul.mubr.msk.bf16.gmra.mrb[16].mxu1 %vm457_vm1, %v5583_v26  ;;  %v6160_v26 = vld [vmem:[%s6858_s1 + $0x20] sm:$0xf]  ;;  %v3051_v24 = vor.u32 %v3050_v47, %v3047_v39  ;;  %v6166_v12 = vsel %vm2918_vm5, %v3033_v3, %v3042_v13  ;;  %v3066_v19 = vshll.u32 %v6147_v50, 16  ;;  %v6178_v3 = vcombine.low %v6150_v36, %v6155_v2 }
  0x89   : > { %4563 = vmatprep.mubr.msk.bf16.mxu1 %vm457_vm1, %v5601_v45  ;;  %v3063_v45 = vshrl.u32 %v6147_v50, 16  ;;  %v3056_v47 = vrot.slane %v3054_v41, 3  ;;  %v3059_v56 = vrot.slane %v3057_v60, 4  ;;  %v2613_v60 = vsel %vm2604_vm7, %v2610_v34, %v2612_v5 }
  0x8a   : > { %v6173_v39 = vsel %vm2918_vm5, %v3042_v13, %v3051_v24  ;;  %v3072_v13 = vshrl.u32 %v6178_v3, 16  ;;  %v3075_v41 = vshll.u32 %v6178_v3, 16  ;;  %v4237_v2 = vcombine.low %v6183_v55, %v6183_v55 }
  0x8b   : > { %4734 = vmatmul.mubr.msk.bf16.vlgmr.msra.gmra.mrb[0].mxu0 %vm457_vm1, %v2609_v44  ;;  %v3065_v44 = vrot.slane %v3063_v45, 3  ;;  %v2615_v45 = vsel %vm2604_vm7, %v2612_v5, %v2614_v8 }
  0x8c   : > { %4770 = vmatpush3.bf16.msra.mxu0 %v3144_v48  ;;  %4737 = vmatprep.mubr.msk.bf16.mxu0 %vm457_vm1, %v2611_v38  ;;  %v3068_v48 = vrot.slane %v3066_v19, 4  ;;  %v3060_v38 = vor.u32 %v3059_v56, %v3056_v47  ;;  %v3074_v19 = vrot.slane %v3072_v13, 3  ;;  %v3077_v47 = vrot.slane %v3075_v41, 4 }
  0x8d   : > { %5144 = vmatprep.subr.msk.bf16.mxu0 %vm512_vm0, %v6160_v26  ;;  %v3081_v34 = vshrl.u32 %v4237_v2, 16 }
  0x8e   : > { %v3069_v32 = vor.u32 %v3068_v48, %v3065_v44  ;;  %v6189_v58 = vsel %vm2918_vm5, %v3051_v24, %v3060_v38  ;;  %v3084_v44 = vshll.u32 %v4237_v2, 16  ;;  %v3078_v24 = vor.u32 %v3077_v47, %v3074_v19 }
  0x8f   : > { %v3083_v5 = vrot.slane %v3081_v34, 3 }
  0x90   : > { %4564 = vmatmul.mubr.msk.bf16.gmra.mrb[20].mxu1 %vm457_vm1, %v5616_v63  ;;  %v6197_v56 = vsel %vm2918_vm5, %v3060_v38, %v3069_v32  ;;  %v2616_v63 = vrot.slane %v5949_v53, 3  ;;  %v3086_v48 = vrot.slane %v3084_v44, 4  ;;  %v2618_v38 = vrot.slane %v5988_v6, 3 }
  0x91   : > { %4567 = vmatprep.mubr.msk.bf16.mxu1 %vm457_vm1, %v5629_v20  ;;  %v6206_v13 = vsel %vm2918_vm5, %v3069_v32, %v3078_v24  ;;  %v2620_v6 = vrot.slane %v6001_v54, 3  ;;  %v909_v32 = vld [vmem:[%s5459_s26] sm:$0xe]  ;;  %v2626_v44 = vrot.slane %v6064_v18, 3  ;;  %v2628_v18 = vrot.slane %v6068_v61, 3 }
  0x92   : > { %v3087_v41 = vor.u32 %v3086_v48, %v3083_v5  ;;  %v2617_v55 = vsel %vm2604_vm7, %v2614_v8, %v2616_v63  ;;  %v2619_v53 = vsel %vm2604_vm7, %v2616_v63, %v2618_v38  ;;  %v2622_v8 = vrot.slane %v6008_v23, 3  ;;  %v5378_v48 = vld [vmem:[%s5459_s26 + $0x10] sm:$0xff]  }
  0x93   : > { %4738 = vmatmul.mubr.msk.bf16.gmra.mrb[4].mxu0 %vm457_vm1, %v2613_v60  ;;  %v5376_v60 = vld [vmem:[%s5459_s26 + $0x4] sm:$0xf]  ;;  %v2621_v19 = vsel %vm2604_vm7, %v2618_v38, %v2620_v6  ;;  %v2624_v23 = vrot.slane %v6014_v9, 3  ;;  %v919_v38 = vrot.slane %v5378_v48, 1  ;;  %v2636_v48 = vrot.slane %v6147_v50, 3  ;;  %v5386_v50 = vld [vmem:[%s5459_s26 + $0x48] sm:$0xff]  }
  0x94   : > { %4741 = vmatprep.mubr.msk.bf16.mxu0 %vm457_vm1, %v2615_v45  ;;  %v6210_v2 = vsel %vm2918_vm5, %v3078_v24, %v3087_v41  ;;  %v4101_v45 = vcombine.low %v909_v32, %v5376_v60  ;;  %v2623_v47 = vsel %vm2604_vm7, %v2620_v6, %v2622_v8  ;;  %v5379_v41 = vld [vmem:[%s5459_s26 + $0x18] sm:$0xff]   ;;  %v1581_v32 = vsel %vm512_vm0, %v5879_v0, 0  ;;  %v5382_v0 = vld [vmem:[%s6858_s1 + $0x10] sm:$0xf] }
  0x95   : > { %v2625_v63 = vsel %vm2604_vm7, %v2622_v8, %v2624_v23  ;;  %v2627_v5 = vsel %vm2604_vm7, %v2624_v23, %v2626_v44  ;;  %v921_v9 = vrot.slane %v5379_v41, 1  ;;  %v2629_v60 = vsel %vm2604_vm7, %v2626_v44, %v2628_v18 }
  0x96   : > { %v916_v54 = vrot.slane %v4101_v45, 1 }
  0x97   : > { %v922_v8 = vsel %vm915_vm6, %v919_v38, %v921_v9 }
  0x98   : > { %4568 = vmatmul.mubr.msk.bf16.gmra.mrb[24].mxu1 %vm457_vm1, %v5648_v43 }
  0x99   : > { %4571 = vmatprep.mubr.msk.bf16.mxu1 %vm457_vm1, %v5668_v15 }
  0x9b   : > { %4742 = vmatmul.mubr.msk.bf16.gmra.mrb[8].mxu0 %vm457_vm1, %v2617_v55  ;;  %v5377_v55 = vld [vmem:[%s5459_s26 + $0x8] sm:$0xff]  }
  0x9c   : > { %4745 = vmatprep.mubr.msk.bf16.mxu0 %vm457_vm1, %v2619_v53  ;;  %v917_v34 = vrot.slane %v5377_v55, 1  ;;  %v2630_v53 = vrot.slane %v6105_v51, 3  ;;  %v5381_v51 = vld [vmem:[%s5459_s26 + $0x28] sm:$0xff]   ;;  %v2634_v55 = vrot.slane %v6135_v33, 3  ;;  %v5384_v33 = vld [vmem:[%s5459_s26 + $0x38] sm:$0xff]  }
  0x9e   : > { %v918_v24 = vsel %vm915_vm6, %v916_v54, %v917_v34  ;;  %v920_v6 = vsel %vm915_vm6, %v917_v34, %v919_v38  ;;  %v2631_v45 = vsel %vm2604_vm7, %v2628_v18, %v2630_v53  ;;  %v2632_v54 = vrot.slane %v6111_v17, 3 }
  0x9f   : > { %v929_v17 = vrot.slane %v5384_v33, 1  ;;  %v2638_v38 = vrot.slane %v6178_v3, 3  ;;  %v2637_v18 = vsel %vm2604_vm7, %v2634_v55, %v2636_v48  ;;  %v933_v3 = vrot.slane %v5386_v50, 1 }
  0xa0   : > { %4572 = vmatmul.mubr.msk.bf16.gmra.mrb[28].mxu1 %vm457_vm1, %v5684_v31  ;;  %v2633_v44 = vsel %vm2604_vm7, %v2630_v53, %v2632_v54  ;;  %v5212_v53 = vld [vmem:[%s5459_s26 + $0xa0] ss:$0 sps:$4 sm:$0x77]   ;;  %v7000_v50 = vshrl.u32 %v5498_v28, 16 }
  0xa1   : > { %4575 = vmatprep.mubr.msk.bf16.mxu1 %vm457_vm1, %v5707_v22 }
  0xa3   : > { %4746 = vmatmul.mubr.msk.bf16.gmra.mrb[12].mxu0 %vm457_vm1, %v2621_v19  ;;  %v5380_v19 = vld [vmem:[%s5459_s26 + $0x20] sm:$0xff]  }
  0xa4   : > { %4749 = vmatprep.mubr.msk.bf16.mxu0 %vm457_vm1, %v2623_v47  ;;  %v923_v61 = vrot.slane %v5380_v19, 1  ;;  %v925_v47 = vrot.slane %v5381_v51, 1  ;;  %v5387_v51 = vld [vmem:[%s5459_s26 + $0x50] sm:$0xff]  }
  0xa6   : > { %v924_v34 = vsel %vm915_vm6, %v921_v9, %v923_v61  ;;  %v926_v23 = vsel %vm915_vm6, %v923_v61, %v925_v47 }
  0xa8   : > { %4576 = vmatmul.mubr.msk.bf16.gmra.mrb[32].mxu1 %vm457_vm1, %v5716_v10 }
  0xa9   : > { %4581 = vmatprep.mubr.msk.bf16.mxu1 %vm457_vm1, %v918_v24  ;;  %v2635_v24 = vsel %vm2604_vm7, %v2632_v54, %v2634_v55 }
  0xab   : > { %4750 = vmatmul.mubr.msk.bf16.gmra.mrb[16].mxu0 %vm457_vm1, %v2625_v63  ;;  %v5383_v63 = vld [vmem:[%s5459_s26 + $0x30] sm:$0xff]  }
  0xac   : > { %4753 = vmatprep.mubr.msk.bf16.mxu0 %vm457_vm1, %v2627_v5  ;;  %v927_v5 = vrot.slane %v5383_v63, 1 }
  0xae   : > { %v928_v41 = vsel %vm915_vm6, %v925_v47, %v927_v5  ;;  %v930_v9 = vsel %vm915_vm6, %v927_v5, %v929_v17  ;;  %v935_v47 = vrot.slane %v5387_v51, 1 }
  0xb0   : > { %4582 = vmatmul.mubr.msk.bf16.vlgmr.msra.gmra.mrb[0].mxu1 %vm457_vm1, %v920_v6  ;;  %v2639_v6 = vsel %vm2604_vm7, %v2636_v48, %v2638_v38  ;;  %v936_v55 = vsel %vm915_vm6, %v933_v3, %v935_v47 }
  0xb1   : > { %4618 = vmatpush3.bf16.msra.mxu1 %v1581_v32  ;;  %4585 = vmatprep.mubr.msk.bf16.mxu1 %vm457_vm1, %v922_v8  ;;  %v5385_v32 = vld [vmem:[%s5459_s26 + $0x40] sm:$0xff]  }
  0xb2   : > { %5140 = vmatprep.subr.msk.bf16.mxu1 %vm512_vm0, %v5382_v0  ;;  %v931_v8 = vrot.slane %v5385_v32, 1  ;;  %v5388_v0 = vld [vmem:[%s5459_s26 + $0x58] sm:$0xff]   ;;  %v6999_v32 = vshll.u32 %v5470_v11, 16 }
  0xb3   : > { %4754 = vmatmul.mubr.msk.bf16.gmra.mrb[20].mxu0 %vm457_vm1, %v2629_v60  ;;  %v2640_v60 = vrot.slane %v5212_v53, 3  ;;  %v937_v54 = vrot.slane %v5388_v0, 1 }
  0xb4   : > { %4757 = vmatprep.mubr.msk.bf16.mxu0 %vm457_vm1, %v2631_v45  ;;  %v932_v45 = vsel %vm915_vm6, %v929_v17, %v931_v8  ;;  %v934_v19 = vsel %vm915_vm6, %v931_v8, %v933_v3  ;;  %v6995_v17 = vrot.slane %v5716_v10, 1  ;;  %v6998_v10 = vshrl.u32 %v5470_v11, 16 }
  0xb5   : > { %v2641_v61 = vsel %vm2604_vm7, %v2638_v38, %v2640_v60  ;;  %v1385_v3 = vrot.slane %v7000_v50, 1  ;;  %v7001_v60 = vshll.u32 %v5498_v28, 16  ;;  %v7003_v28 = vshll.u32 %v5502_v30, 16 }
  0xb7   : > { %v1397_v51 = vrot.slane %v7003_v28, 2 }
  0xb8   : > { %4586 = vmatmul.mubr.msk.bf16.gmra.mrb[4].mxu1 %vm457_vm1, %v924_v34  ;;  %v938_v34 = vsel %vm915_vm6, %v935_v47, %v937_v54  ;;  %v7004_v47 = vshrl.u32 %v5529_v49, 16 }
  0xb9   : > { %4589 = vmatprep.mubr.msk.bf16.mxu1 %vm457_vm1, %v926_v23  ;;  %v3434_v23 = vsel %vm512_vm0, %v6160_v26, 0  ;;  %v943_v26 = vrot.slane %v5668_v15, 1  ;;  %v947_v15 = vrot.slane %v5707_v22, 1  ;;  %v6997_v22 = vshll.u32 %v5463_v7, 16 }
  0xba   : > { %v1403_v0 = vrot.slane %v7004_v47, 1 }
  0xbb   : > { %4758 = vmatmul.mubr.msk.bf16.gmra.mrb[24].mxu0 %vm457_vm1, %v2633_v44  ;;  %v939_v44 = vrot.slane %v5629_v20, 1  ;;  %v945_v20 = vrot.slane %v5684_v31, 1  ;;  %v950_v48 = vsel %vm915_vm6, %v947_v15, %v6995_v17  ;;  %v1370_v53 = vrot.slane %v6997_v22, 2 }
  0xbc   : > { %4761 = vmatprep.mubr.msk.bf16.mxu0 %vm457_vm1, %v2635_v24 }
  0xbd   : > { %v940_v24 = vsel %vm915_vm6, %v937_v54, %v939_v44  ;;  %v946_v33 = vsel %vm915_vm6, %v943_v26, %v945_v20  ;;  %v7005_v54 = vshll.u32 %v5529_v49, 16 }
  0xc0   : > { %4590 = vmatmul.mubr.msk.bf16.gmra.mrb[8].mxu1 %vm457_vm1, %v928_v41 }
  0xc1   : > { %4593 = vmatprep.mubr.msk.bf16.mxu1 %vm457_vm1, %v930_v9  ;;  %v6996_v9 = vshrl.u32 %v5463_v7, 16  ;;  %v1379_v7 = vrot.slane %v6999_v32, 2 }
  0xc3   : > { %4762 = vmatmul.mubr.msk.bf16.gmra.mrb[28].mxu0 %vm457_vm1, %v2637_v18  ;;  %v1367_v18 = vrot.slane %v6996_v9, 1 }
  0xc4   : > { %4765 = vmatprep.mubr.msk.bf16.mxu0 %vm457_vm1, %v2639_v6  ;;  %v1376_v6 = vrot.slane %v6998_v10, 1  ;;  %v7022_v10 = vld [vmem:[#allocation13_spill] sm:$0xff] }
  0xc8   : > { %4594 = vmatmul.mubr.msk.bf16.gmra.mrb[12].mxu1 %vm457_vm1, %v932_v45 }
  0xc9   : > { %4597 = vmatprep.mubr.msk.bf16.mxu1 %vm457_vm1, %v934_v19  ;;  %v7002_v19 = vshrl.u32 %v5502_v30, 16 }
  0xcb   : > { %4766 = vmatmul.mubr.msk.bf16.gmra.mrb[32].mxu0 %vm457_vm1, %v2641_v61  ;;  %v1394_v61 = vrot.slane %v7002_v19, 1 }
  0xcc   : > { %4771 = vmatprep.mubr.msk.bf16.mxu0 %vm457_vm1, %v5943_v29  ;;  %v941_v29 = vrot.slane %v5648_v43, 1  ;;  %v1223_v43 = vld [vmem:[%s5459_s26 + $0x8] sm:$0xe] }
  0xce   : > { %v942_v63 = vsel %vm915_vm6, %v939_v44, %v941_v29 }
  0xd0   : > { %4598 = vmatmul.mubr.msk.bf16.gmra.mrb[16].mxu1 %vm457_vm1, %v936_v55 }
  0xd1   : > { %4601 = vmatprep.mubr.msk.bf16.mxu1 %vm457_vm1, %v938_v34  ;;  %v7006_v34 = vshrl.u32 %v5535_v52, 16 }
  0xd3   : > { %4772 = vmatmul.mubr.msk.bf16.vlgmr.msra.gmra.mrb[0].mxu0 %vm457_vm1, %v5958_v59  ;;  %v944_v59 = vsel %vm915_vm6, %v941_v29, %v943_v26  ;;  %v1412_v49 = vrot.slane %v7006_v34, 1  ;;  %v7008_v29 = vshrl.u32 %v5552_v62, 16 }
  0xd4   : > { %4808 = vmatpush3.bf16.msra.mxu0 %v3434_v23  ;;  %4775 = vmatprep.mubr.msk.bf16.mxu0 %vm457_vm1, %v5997_v16  ;;  %v5389_v16 = vld [vmem:[%s5459_s26 + $0xc] sm:$0xf]  ;;  %v7007_v23 = vshll.u32 %v5535_v52, 16 }
  0xd5   : > { %v4121_v5 = vcombine.low %v1223_v43, %v5389_v16 }
  0xd6   : > { %v1415_v44 = vrot.slane %v7007_v23, 2 }
  0xd7   : > { %v1360_v31 = vshll.u32 %v4121_v5, 16 }
  0xd8   : > { %4602 = vmatmul.mubr.msk.bf16.gmra.mrb[20].mxu1 %vm457_vm1, %v940_v24  ;;  %v1421_v24 = vrot.slane %v7008_v29, 1  ;;  %v7038_v29 = vld [vmem:[#allocation17_spill] sm:$0xff] }
  0xd9   : > { %4605 = vmatprep.mubr.msk.bf16.mxu1 %vm457_vm1, %v942_v63  ;;  %v1362_v41 = vrot.slane %v1360_v31, 2  ;;  %v7009_v63 = vshll.u32 %v5552_v62, 16  ;;  %v7011_v62 = vshll.u32 %v5569_v14, 16 }
  0xdb   : > { %4776 = vmatmul.mubr.msk.bf16.gmra.mrb[4].mxu0 %vm457_vm1, %v6004_v37  ;;  %v1357_v37 = vshrl.u32 %v4121_v5, 16  ;;  %v7012_v5 = vld [vmem:[#allocation2_spill] sm:$0xff] }
  0xdc   : > { %4779 = vmatprep.mubr.msk.bf16.mxu0 %vm457_vm1, %v6019_v4  ;;  %v948_v4 = vsel %vm915_vm6, %v945_v20, %v947_v15  ;;  %v7010_v20 = vshrl.u32 %v5569_v14, 16 }
  0xdd   : > { %v1359_v38 = vrot.slane %v1357_v37, 1  ;;  %v7014_v37 = vshll.u32 %v7012_v5, 16 }
  0xde   : > { %v1430_v43 = vrot.slane %v7010_v20, 1 }
  0xe0   : > { %4606 = vmatmul.mubr.msk.bf16.gmra.mrb[24].mxu1 %vm457_vm1, %v944_v59  ;;  %v1433_v59 = vrot.slane %v7011_v62, 2  ;;  %v7043_v62 = vld [vmem:[#allocation19_spill] sm:$0xff] }
  0xe1   : > { %4609 = vmatprep.mubr.msk.bf16.mxu1 %vm457_vm1, %v946_v33  ;;  %v7013_v33 = vshrl.u32 %v7012_v5, 16 }
  0xe3   : > { %4780 = vmatmul.mubr.msk.bf16.gmra.mrb[8].mxu0 %vm457_vm1, %v6025_v27  ;;  %v1363_v27 = vor.u32 %v1362_v41, %v1359_v38  ;;  %v1439_v15 = vrot.slane %v7013_v33, 1 }
  0xe4   : > { %4783 = vmatprep.mubr.msk.bf16.mxu0 %vm457_vm1, %v6056_v40  ;;  %v1371_v40 = vor.u32 %v1370_v53, %v1367_v18  ;;  %v7018_v18 = vld [vmem:[#allocation4_spill] sm:$0xff] }
  0xe5   : > { %v7019_v22 = vshrl.u32 %v7018_v18, 16 }
  0xe6   : > { %v1372_v8 = vsel %vm1355_vm8, %v1363_v27, %v1371_v40  ;;  %v7020_v27 = vshll.u32 %v7018_v18, 16 }
  0xe7   : > { %v1457_v53 = vrot.slane %v7019_v22, 1 }
  0xe8   : > { %4610 = vmatmul.mubr.msk.bf16.gmra.mrb[28].mxu1 %vm457_vm1, %v948_v4  ;;  %v7015_v4 = vld [vmem:[#allocation3_spill] sm:$0xff] }
  0xe9   : > { %4613 = vmatprep.mubr.msk.bf16.mxu1 %vm457_vm1, %v950_v48  ;;  %v7016_v17 = vshrl.u32 %v7015_v4, 16  ;;  %v7017_v38 = vshll.u32 %v7015_v4, 16 }
  0xeb   : > { %4784 = vmatmul.mubr.msk.bf16.gmra.mrb[12].mxu0 %vm457_vm1, %v6060_v25  ;;  %v1388_v25 = vrot.slane %v7001_v60, 2  ;;  %v1448_v48 = vrot.slane %v7016_v17, 1  ;;  %v1451_v41 = vrot.slane %v7017_v38, 2  ;;  %v7047_v17 = vld [vmem:[#allocation22_spill] sm:$0xff] }
  0xec   : > { %4787 = vmatprep.mubr.msk.bf16.mxu0 %vm457_vm1, %v6079_v57  ;;  %v1380_v57 = vor.u32 %v1379_v7, %v1376_v6 }
  0xed   : > { %v1389_v45 = vor.u32 %v1388_v25, %v1385_v3 }
  0xee   : > { %v1381_v11 = vsel %vm1355_vm8, %v1371_v40, %v1380_v57  ;;  %v7021_v40 = vld [vmem:[#allocation14_spill] sm:$0xff] }
  0xef   : > { %v4257_v6 = vcombine.low %v7022_v10, %v7021_v40  ;;  %v7053_v40 = vld [vmem:[#allocation23_spill] sm:$0xff] }
  0xf0   : > { %4614 = vmatmul.mubr.msk.bf16.gmra.mrb[32].mxu1 %vm457_vm1, %v6042_v46  ;;  %v1390_v46 = vsel %vm1355_vm8, %v1380_v57, %v1389_v45 }
  0xf1   : > { %4619 = vmatprep.mubr.msk.bf16.mxu1 %vm457_vm1, %v1372_v8  ;;  %v7023_v8 = vld [vmem:[#allocation7_spill] sm:$0xff] }
  0xf2   : > { %v7024_v50 = vshrl.u32 %v7023_v8, 16  ;;  %v7025_v60 = vshll.u32 %v7023_v8, 16 }
  0xf3   : > { %4788 = vmatmul.mubr.msk.bf16.gmra.mrb[16].mxu0 %vm457_vm1, %v6094_v35  ;;  %v1406_v35 = vrot.slane %v7005_v54, 2  ;;  %v7032_v54 = vld [vmem:[#allocation6_spill] sm:$0xff] }
  0xf4   : > { %4791 = vmatprep.mubr.msk.bf16.mxu0 %vm457_vm1, %v6131_v42  ;;  %v1398_v42 = vor.u32 %v1397_v51, %v1394_v61  ;;  %v1466_v3 = vrot.slane %v7024_v50, 1  ;;  %v1469_v25 = vrot.slane %v7025_v60, 2  ;;  %v7030_v51 = vld [vmem:[#allocation15_spill] sm:$0xff]  ;;  %v7054_v60 = vld [vmem:[#allocation26_spill] sm:$0xff] }
  0xf5   : > { %v1407_v30 = vor.u32 %v1406_v35, %v1403_v0  ;;  %v7031_v0 = vld [vmem:[#allocation5_spill] sm:$0xff] }
  0xf6   : > { %v1399_v55 = vsel %vm1355_vm8, %v1389_v45, %v1398_v42  ;;  %v7026_v45 = vld [vmem:[#allocation8_spill] sm:$0xff]  ;;  %v1470_v47 = vor.u32 %v1469_v25, %v1466_v3  ;;  %v7033_v35 = vcombine.low %v7031_v0, %v7032_v54  ;;  %v7055_v25 = vld [vmem:[#allocation25_spill] sm:$0xff] }
  0xf7   : > { %v7028_v61 = vshll.u32 %v7026_v45, 16  ;;  %v7059_v0 = vld [vmem:[#allocation29_spill] sm:$0xff] }
  0xf8   : > { %4620 = vmatmul.mubr.msk.bf16.vlgmr.msra.gmra.mrb[0].mxu1 %vm457_vm1, %v1381_v11  ;;  %v7027_v11 = vshrl.u32 %v7026_v45, 16 }
  0xf9   : > { %4846 = vmatpush3.bf16.msra.mxu1 %v5440_v1  ;;  %4623 = vmatprep.mubr.msk.bf16.mxu1 %vm457_vm1, %v1390_v46  ;;  %v1408_v1 = vsel %vm1355_vm8, %v1398_v42, %v1407_v30  ;;  %v1478_v28 = vrot.slane %v7028_v61, 2 }
  0xfa   : > { %v1475_v19 = vrot.slane %v7027_v11, 1  ;;  %v7056_v11 = vld [vmem:[#allocation28_spill] sm:$0xff] }
  0xfb   : > { %4792 = vmatmul.mubr.msk.bf16.gmra.mrb[20].mxu0 %vm457_vm1, %v6138_v21  ;;  %v1424_v21 = vrot.slane %v7009_v63, 2 }
  0xfc   : > { %4795 = vmatprep.mubr.msk.bf16.mxu0 %vm457_vm1, %v6166_v12  ;;  %v1416_v12 = vor.u32 %v1415_v44, %v1412_v49  ;;  %v1479_v42 = vor.u32 %v1478_v28, %v1475_v19  ;;  %v7057_v19 = vld [vmem:[#allocation27_spill] sm:$0xff] }
  0xfd   : > { %v1425_v26 = vor.u32 %v1424_v21, %v1421_v24  ;;  %v7039_v21 = vld [vmem:[#allocation10_spill] sm:$0xff]  ;;  %v4265_v61 = vcombine.low %v7057_v19, %v7056_v11 }
  0xfe   : > { %v1417_v52 = vsel %vm1355_vm8, %v1407_v30, %v1416_v12  ;;  %v1480_v63 = vsel %vm1355_vm8, %v1470_v47, %v1479_v42 }
  0xff   : > { %v1426_v16 = vsel %vm1355_vm8, %v1416_v12, %v1425_v26  ;;  %v7040_v12 = vshrl.u32 %v7039_v21, 16 }
 0x100   : > { %4624 = vmatmul.mubr.msk.bf16.gmra.mrb[4].mxu1 %vm457_vm1, %v1399_v55  ;;  %v7034_v55 = vld [vmem:[#allocation9_spill] sm:$0xff] }
 0x101   : > { %4627 = vmatprep.mubr.msk.bf16.mxu1 %vm457_vm1, %v1408_v1  ;;  %v7035_v34 = vshrl.u32 %v7034_v55, 16  ;;  %v7036_v23 = vshll.u32 %v7034_v55, 16  ;;  %v7037_v1 = vld [vmem:[#allocation18_spill] sm:$0xff]  ;;  %v7062_v55 = vld [vmem:[#allocation31_spill] sm:$0xff] }
 0x102   : > { %v4260_v24 = vcombine.low %v7038_v29, %v7037_v1  ;;  %v7063_v29 = vld [vmem:[#allocation34_spill] sm:$0xff] }
 0x103   : > { %4796 = vmatmul.mubr.msk.bf16.gmra.mrb[24].mxu0 %vm457_vm1, %v6173_v39  ;;  %v1442_v39 = vrot.slane %v7014_v37, 2  ;;  %v1484_v49 = vrot.slane %v7035_v34, 1  ;;  %v1487_v44 = vrot.slane %v7036_v23, 2 }
 0x104   : > { %4799 = vmatprep.mubr.msk.bf16.mxu0 %vm457_vm1, %v6189_v58  ;;  %v1434_v58 = vor.u32 %v1433_v59, %v1430_v43  ;;  %v7042_v43 = vld [vmem:[#allocation20_spill] sm:$0xff] }
 0x105   : > { %v1443_v31 = vor.u32 %v1442_v39, %v1439_v15  ;;  %v4261_v59 = vcombine.low %v7043_v62, %v7042_v43  ;;  %v7044_v15 = vld [vmem:[#allocation11_spill] sm:$0xff]  ;;  %v5394_v62 = vld [vmem:[%s5459_s26 + $0x80] sm:$0xff]  }
 0x106   : > { %v1435_v14 = vsel %vm1355_vm8, %v1425_v26, %v1434_v58  ;;  %v1493_v26 = vrot.slane %v7040_v12, 1  ;;  %v7045_v37 = vshrl.u32 %v7044_v15, 16  ;;  %v7065_v12 = vld [vmem:[#allocation36_spill] sm:$0xff] }
 0x107   : > { %v1444_v9 = vsel %vm1355_vm8, %v1434_v58, %v1443_v31  ;;  %v7046_v58 = vshll.u32 %v7044_v15, 16 }
 0x108   : > { %4628 = vmatmul.mubr.msk.bf16.gmra.mrb[8].mxu1 %vm457_vm1, %v1417_v52  ;;  %v7041_v52 = vshll.u32 %v7039_v21, 16  ;;  %v1502_v39 = vrot.slane %v7045_v37, 1 }
 0x109   : > { %4631 = vmatprep.mubr.msk.bf16.mxu1 %vm457_vm1, %v1426_v16  ;;  %v1488_v16 = vor.u32 %v1487_v44, %v1484_v49  ;;  %v5391_v49 = vld [vmem:[%s5459_s26 + $0x68] sm:$0xff]   ;;  %v5392_v44 = vld [vmem:[%s5459_s26 + $0x70] sm:$0xff]  }
 0x10a   : > { %v1496_v20 = vrot.slane %v7041_v52, 2  ;;  %v1826_v23 = vrot.slane %v5391_v49, 2  ;;  %v1828_v1 = vrot.slane %v5392_v44, 2 }
 0x10b   : > { %4800 = vmatmul.mubr.msk.bf16.gmra.mrb[28].mxu0 %vm457_vm1, %v6197_v56  ;;  %v1460_v56 = vrot.slane %v7020_v27, 2  ;;  %v1489_v33 = vsel %vm1355_vm8, %v1479_v42, %v1488_v16 }
 0x10c   : > { %4803 = vmatprep.mubr.msk.bf16.mxu0 %vm457_vm1, %v6206_v13  ;;  %v1452_v13 = vor.u32 %v1451_v41, %v1448_v48  ;;  %v1497_v5 = vor.u32 %v1496_v20, %v1493_v26  ;;  %v7048_v48 = vld [vmem:[#allocation21_spill] sm:$0xff]  ;;  %v1829_v21 = vsel %vm1802_vm2, %v1826_v23, %v1828_v1  ;;  %v7066_v26 = vld [vmem:[#allocation35_spill] sm:$0xff] }
 0x10d   : > { %v1461_v32 = vor.u32 %v1460_v56, %v1457_v53  ;;  %v4262_v38 = vcombine.low %v7048_v48, %v7047_v17  ;;  %v7052_v56 = vld [vmem:[#allocation24_spill] sm:$0xff]  ;;  %v4269_v52 = vcombine.low %v7066_v26, %v7065_v12  ;;  %v5393_v20 = vld [vmem:[%s5459_s26 + $0x78] sm:$0xff]   ;;  %v5395_v17 = vld [vmem:[%s5459_s26 + $0x88] sm:$0xff]  }
 0x10e   : > { %v1453_v7 = vsel %vm1355_vm8, %v1443_v31, %v1452_v13  ;;  %v1505_v31 = vrot.slane %v7046_v58, 2  ;;  %v1498_v41 = vsel %vm1355_vm8, %v1488_v16, %v1497_v5  ;;  %v4263_v10 = vcombine.low %v7053_v40, %v7052_v56  ;;  %v7070_v58 = vld [vmem:[#allocation39_spill] sm:$0xff] }
 0x10f   : > { %v1462_v57 = vsel %vm1355_vm8, %v1452_v13, %v1461_v32  ;;  %v1471_v30 = vsel %vm1355_vm8, %v1461_v32, %v1470_v47  ;;  %v7058_v47 = vld [vmem:[#allocation30_spill] sm:$0xff]  ;;  %v1830_v43 = vrot.slane %v5393_v20, 2  ;;  %v1834_v48 = vrot.slane %v5395_v17, 2  ;;  %v7073_v56 = vld [vmem:[#allocation43_spill] sm:$0xff] }
 0x110   : > { %4632 = vmatmul.mubr.msk.bf16.gmra.mrb[12].mxu1 %vm457_vm1, %v1435_v14  ;;  %v6469_v14 = vld [vmem:[%s5459_s26 + $0x98] ss:$0 sps:$4 sm:$0x33]   ;;  %v4266_v54 = vcombine.low %v7059_v0, %v7058_v47  ;;  %v4273_v40 = vcombine.low %v7073_v56, %v6150_v36 }
 0x111   : > { %4635 = vmatprep.mubr.msk.bf16.mxu1 %vm457_vm1, %v1444_v9  ;;  %v7049_v9 = vld [vmem:[#allocation12_spill] sm:$0xff]  ;;  %v1518_v13 = vshrl.u32 %v6469_v14, 16  ;;  %v1521_v32 = vshll.u32 %v6469_v14, 16  ;;  %v1831_v16 = vsel %vm1802_vm2, %v1828_v1, %v1830_v43 }
 0x112   : > { %v7050_v18 = vshrl.u32 %v7049_v9, 16  ;;  %v7051_v53 = vshll.u32 %v7049_v9, 16 }
 0x113   : > { %4804 = vmatmul.mubr.msk.bf16.gmra.mrb[32].mxu0 %vm457_vm1, %v6210_v2  ;;  %v7029_v2 = vld [vmem:[#allocation16_spill] sm:$0xff]  ;;  %v1520_v50 = vrot.slane %v1518_v13, 1  ;;  %v1523_v3 = vrot.slane %v1521_v32, 2  ;;  %v7074_v13 = vld [vmem:[#allocation45_spill] sm:$0xff] }
 0x114   : > { %4809 = vmatprep.mubr.msk.bf16.mxu0 %vm457_vm1, %v4257_v6  ;;  %v4259_v46 = vcombine.low %v7030_v51, %v7029_v2  ;;  %v1511_v22 = vrot.slane %v7050_v18, 1  ;;  %v1514_v27 = vrot.slane %v7051_v53, 2  ;;  %v1506_v6 = vor.u32 %v1505_v31, %v1502_v39  ;;  %v5390_v2 = vld [vmem:[%s5459_s26 + $0x60] sm:$0xff]   ;;  %v7069_v39 = vld [vmem:[#allocation40_spill] sm:$0xff] }
 0x115   : > { %v1524_v28 = vor.u32 %v1523_v3, %v1520_v50  ;;  %v1824_v51 = vrot.slane %v5390_v2, 2  ;;  %v4271_v31 = vcombine.low %v7070_v58, %v7069_v39  ;;  %v7071_v18 = vld [vmem:[#allocation42_spill] sm:$0xff]  ;;  %v7075_v32 = vld [vmem:[#allocation44_spill] sm:$0xff] }
 0x116   : > { %v1507_v8 = vsel %vm1355_vm8, %v1497_v5, %v1506_v6  ;;  %v7067_v5 = vld [vmem:[#allocation38_spill] sm:$0xff] }
 0x118   : > { %4636 = vmatmul.mubr.msk.bf16.gmra.mrb[16].mxu1 %vm457_vm1, %v1453_v7  ;;  %v1515_v7 = vor.u32 %v1514_v27, %v1511_v22  ;;  %v7072_v22 = vld [vmem:[#allocation41_spill] sm:$0xff] }
 0x119   : > { %4639 = vmatprep.mubr.msk.bf16.mxu1 %vm457_vm1, %v1462_v57  ;;  %v4264_v57 = vcombine.low %v7055_v25, %v7054_v60  ;;  %v4272_v53 = vcombine.low %v7072_v22, %v7071_v18 }
 0x11a   : > { %v1516_v45 = vsel %vm1355_vm8, %v1506_v6, %v1515_v7 }
 0x11b   : > { %4810 = vmatmul.mubr.msk.bf16.vlgmr.msra.gmra.mrb[0].mxu0 %vm457_vm1, %v7033_v35  ;;  %v7060_v35 = vrot.slane %v7015_v4, 2  ;;  %v1827_v4 = vsel %vm1802_vm2, %v1824_v51, %v1826_v23 }
 0x11c   : > { %4813 = vmatprep.mubr.msk.bf16.mxu0 %vm457_vm1, %v4259_v46  ;;  %v1525_v46 = vsel %vm1355_vm8, %v1515_v7, %v1524_v28  ;;  %v4274_v7 = vcombine.low %v7075_v32, %v7074_v13 }
 0x11d   : > { %v1825_v42 = vsel %vm1802_vm2, %v7060_v35, %v1824_v51 }
 0x120   : > { %4640 = vmatmul.mubr.msk.bf16.gmra.mrb[20].mxu1 %vm457_vm1, %v1471_v30  ;;  %v7061_v30 = vld [vmem:[#allocation32_spill] sm:$0xff] }
 0x121   : > { %4643 = vmatprep.mubr.msk.bf16.mxu1 %vm457_vm1, %v1480_v63  ;;  %v4267_v34 = vcombine.low %v7062_v55, %v7061_v30 }
 0x123   : > { %4814 = vmatmul.mubr.msk.bf16.gmra.mrb[4].mxu0 %vm457_vm1, %v4260_v24  ;;  %v7064_v24 = vld [vmem:[#allocation33_spill] sm:$0xff] }
 0x124   : > { %4817 = vmatprep.mubr.msk.bf16.mxu0 %vm457_vm1, %v4261_v59  ;;  %v4268_v63 = vcombine.low %v7064_v24, %v7063_v29  ;;  %v1832_v59 = vrot.slane %v5394_v62, 2 }
 0x126   : > { %v1833_v37 = vsel %vm1802_vm2, %v1830_v43, %v1832_v59  ;;  %v1835_v9 = vsel %vm1802_vm2, %v1832_v59, %v1834_v48 }
 0x128   : > { %4644 = vmatmul.mubr.msk.bf16.gmra.mrb[24].mxu1 %vm457_vm1, %v1489_v33  ;;  %v7068_v33 = vld [vmem:[#allocation37_spill] sm:$0xff] }
 0x129   : > { %4647 = vmatprep.mubr.msk.bf16.mxu1 %vm457_vm1, %v1498_v41  ;;  %v4270_v15 = vcombine.low %v7068_v33, %v7067_v5 }
 0x12b   : > { %4818 = vmatmul.mubr.msk.bf16.gmra.mrb[8].mxu0 %vm457_vm1, %v4262_v38  ;;  %v5396_v38 = vld [vmem:[%s5459_s26 + $0x90] sm:$0xff]  }
 0x12c   : > { %4821 = vmatprep.mubr.msk.bf16.mxu0 %vm457_vm1, %v4263_v10  ;;  %v1836_v41 = vrot.slane %v5396_v38, 2  ;;  %v1838_v10 = vrot.slane %v6469_v14, 2 }
 0x12e   : > { %v1837_v27 = vsel %vm1802_vm2, %v1834_v48, %v1836_v41  ;;  %v1839_v6 = vsel %vm1802_vm2, %v1836_v41, %v1838_v10 }
 0x130   : > { %4648 = vmatmul.mubr.msk.bf16.gmra.mrb[28].mxu1 %vm457_vm1, %v1507_v8 }
 0x131   : > { %4651 = vmatprep.mubr.msk.bf16.mxu1 %vm457_vm1, %v1516_v45 }
 0x133   : > { %4822 = vmatmul.mubr.msk.bf16.gmra.mrb[12].mxu0 %vm457_vm1, %v4264_v57 }
 0x134   : > { %4825 = vmatprep.mubr.msk.bf16.mxu0 %vm457_vm1, %v4265_v61 }
 0x138   : > { %4652 = vmatmul.mubr.msk.bf16.gmra.mrb[32].mxu1 %vm457_vm1, %v1525_v46 }
 0x139   : > { %4677 = vmatprep.mubr.msk.bf16.mxu1 %vm457_vm1, %v1825_v42  ;;  %v6572_v42 = vld [vmem:[%s6859_s2] ss:$0 sm:$0xff] }
 0x13b   : > { %4826 = vmatmul.mubr.msk.bf16.gmra.mrb[16].mxu0 %vm457_vm1, %v4266_v54 }
 0x13c   : > { %4829 = vmatprep.mubr.msk.bf16.mxu0 %vm457_vm1, %v4267_v34 }
 0x140   : > { %4678 = vmatmul.mubr.msk.bf16.vlgmr.msra.gmra.mrb[20].mxu1 %vm457_vm1, %v1827_v4 }
 0x141   : > { %4681 = vmatprep.mubr.msk.bf16.mxu1 %vm457_vm1, %v1829_v21 }
 0x143   : > { %4830 = vmatmul.mubr.msk.bf16.gmra.mrb[20].mxu0 %vm457_vm1, %v4268_v63 }
 0x144   : > { %4833 = vmatprep.mubr.msk.bf16.mxu0 %vm457_vm1, %v4269_v52 }
 0x148   : > { %4682 = vmatmul.mubr.msk.bf16.gmra.mrb[24].mxu1 %vm457_vm1, %v1831_v16 }
 0x149   : > { %4685 = vmatprep.mubr.msk.bf16.mxu1 %vm457_vm1, %v1833_v37 }
 0x14b   : > { %4834 = vmatmul.mubr.msk.bf16.gmra.mrb[24].mxu0 %vm457_vm1, %v4270_v15 }
 0x14c   : > { %4837 = vmatprep.mubr.msk.bf16.mxu0 %vm457_vm1, %v4271_v31 }
 0x150   : > { %4686 = vmatmul.mubr.msk.bf16.gmra.mrb[28].mxu1 %vm457_vm1, %v1835_v9 }
 0x151   : > { %4689 = vmatprep.mubr.msk.bf16.mxu1 %vm457_vm1, %v1837_v27 }
 0x153   : > { %4838 = vmatmul.mubr.msk.bf16.gmra.mrb[28].mxu0 %vm457_vm1, %v4272_v53 }
 0x154   : > { %4841 = vmatprep.mubr.msk.bf16.mxu0 %vm457_vm1, %v4273_v40 }
 0x158   : > { %4690 = vmatmul.mubr.msk.bf16.gmra.mrb[32].mxu1 %vm457_vm1, %v1839_v6 }
 0x15b   : > { %4842 = vmatmul.mubr.msk.bf16.gmra.mrb[32].mxu0 %vm457_vm1, %v4274_v7 }
 0x1cb   : > { %v4621_v36 = vpop.f32.mrb[0].mxu1 }
 0x1cc   : > { %v1617_v8 = vpop.f32.mrb[1].mxu1 }
 0x1cd   : > { %v4622_v50 = vpop.f32.mrb[2].mxu1 }
 0x1ce   : > { %v1620_v3 = vpop.f32.mrb[3].mxu1 }
 0x1d3   : > { %v4625_v60 = vpop.f32.mrb[4].mxu1 }
 0x1d4   : > { %v1633_v25 = vpop.f32.mrb[5].mxu1 }
 0x1d5   : > { %v4626_v14 = vpop.f32.mrb[6].mxu1 }
 0x1d6   : > { %v1636_v57 = vpop.f32.mrb[7].mxu1 }
 0x1db   : > { %v4629_v45 = vpop.f32.mrb[8].mxu1 }
 0x1dc   : > { %v1649_v11 = vpop.f32.mrb[9].mxu1 }
 0x1dd   : > { %v6551_v19 = vpop.f32.mrb[10].mxu1 }
 0x1de   : > { %v6553_v61 = vpop.f32.mrb[11].mxu1 }
 0x1e3   : > { %v6555_v28 = vpop.f32.mrb[12].mxu1 }
 0x1e4   : > { %v6557_v2 = vpop.f32.mrb[13].mxu1 }
 0x1e5   : > { %v6559_v51 = vpop.f32.mrb[14].mxu1 }
 0x1e6   : > { %v6561_v46 = vpop.f32.mrb[15].mxu1 }
 0x1eb   : > { %v6563_v47 = vpop.f32.mrb[16].mxu1 }
 0x1ec   : > { %v6565_v0 = vpop.f32.mrb[17].mxu1 }
 0x1ed   : > { %v6567_v54 = vpop.f32.mrb[18].mxu1 }
 0x1ee   : > { %v4811_v35 = vpop.f32.mrb[0].mxu0  ;;  %v6574_v30 = vpop.f32.mrb[19].mxu1 }
 0x1ef   : > { %v4847_v55 = vadd.f32 %v4811_v35, %v4621_v36  ;;  %v3470_v34 = vpop.f32.mrb[1].mxu0 }
 0x1f0   : > { %v4848_v49 = vadd.f32 %v3470_v34, %v1617_v8  ;;  %v4812_v23 = vpop.f32.mrb[2].mxu0 }
 0x1f1   : > { %v6577_v44 = vadd.f32 %v4847_v55, %v6572_v42  ;;  %v4849_v1 = vadd.f32 %v4812_v23, %v4622_v50  ;;  %v3473_v4 = vpop.f32.mrb[3].mxu0 }
 0x1f2   : > { %v6580_v29 = vadd.f32 %v4848_v49, %v6572_v42  ;;  %v4850_v24 = vadd.f32 %v3473_v4, %v1620_v3 }
 0x1f3   : > { %v4296_v63 = vmul.f32 -1.442695, %v6577_v44  ;;  %v6584_v21 = vadd.f32 %v4849_v1, %v6572_v42 }
 0x1f4   : > { %v4294_v12 = vmul.f32 -1.442695, %v6580_v29  ;;  %v6588_v26 = vadd.f32 %v4850_v24, %v6572_v42 }
 0x1f5   : > { %5232 = vpow2.f32 %v4296_v63  ;;  %v4297_v52 = vmul.f32 -1.442695, %v6584_v21 }
 0x1f6   : > { %5234 = vpow2.f32 %v4294_v12  ;;  %v4295_v20 = vmul.f32 -1.442695, %v6588_v26  ;;  %v4815_v43 = vpop.f32.mrb[4].mxu0 }
 0x1f7   : > { %5236 = vpow2.f32 %v4297_v52  ;;  %v4851_v62 = vadd.f32 %v4815_v43, %v4625_v60  ;;  %v3486_v59 = vpop.f32.mrb[5].mxu0 }
 0x1f8   : > { %5238 = vpow2.f32 %v4295_v20  ;;  %v4852_v16 = vadd.f32 %v3486_v59, %v1633_v25  ;;  %v4816_v5 = vpop.f32.mrb[6].mxu0 }
 0x1f9   : > { %v6593_v33 = vadd.f32 %v4851_v62, %v6572_v42  ;;  %v4853_v15 = vadd.f32 %v4816_v5, %v4626_v14  ;;  %v3489_v37 = vpop.f32.mrb[7].mxu0 }
 0x1fa   : > { %v6596_v39 = vadd.f32 %v4852_v16, %v6572_v42  ;;  %v4854_v58 = vadd.f32 %v3489_v37, %v1636_v57 }
 0x1fb   : > { %v4300_v31 = vmul.f32 -1.442695, %v6593_v33  ;;  %v6600_v17 = vadd.f32 %v4853_v15, %v6572_v42 }
 0x1fc   : > { %v4298_v48 = vmul.f32 -1.442695, %v6596_v39  ;;  %v6604_v38 = vadd.f32 %v4854_v58, %v6572_v42 }
 0x1fd   : > { %5240 = vpow2.f32 %v4300_v31  ;;  %v4301_v41 = vmul.f32 -1.442695, %v6600_v17 }
 0x1fe   : > { %5242 = vpow2.f32 %v4298_v48  ;;  %v4299_v9 = vmul.f32 -1.442695, %v6604_v38  ;;  %v4819_v18 = vpop.f32.mrb[8].mxu0 }
 0x1ff   : > { %v5233_v22 = vpop.eup %5232  ;;  %5244 = vpow2.f32 %v4301_v41  ;;  %v4855_v53 = vadd.f32 %v4819_v18, %v4629_v45  ;;  %v3502_v27 = vpop.f32.mrb[9].mxu0 }
 0x200   : > { %v5235_v56 = vpop.eup %5234  ;;  %v3802_v40 = vadd.f32 1.0, %v5233_v22  ;;  %5246 = vpow2.f32 %v4299_v9  ;;  %v4856_v10 = vadd.f32 %v3502_v27, %v1649_v11  ;;  %v4820_v6 = vpop.f32.mrb[10].mxu0 }
 0x201   : > { %v5237_v13 = vpop.eup %5236  ;;  %v3800_v32 = vadd.f32 1.0, %v5235_v56  ;;  %v6614_v7 = vadd.f32 %v4855_v53, %v6572_v42  ;;  %v4857_v36 = vadd.f32 %v4820_v6, %v6551_v19  ;;  %v3505_v8 = vpop.f32.mrb[11].mxu0 }
 0x202   : > { %v5239_v50 = vpop.eup %5238  ;;  %5248 = vrcp.f32 %v3802_v40  ;;  %v3803_v3 = vadd.f32 1.0, %v5237_v13  ;;  %v6618_v60 = vadd.f32 %v4856_v10, %v6572_v42  ;;  %v4858_v25 = vadd.f32 %v3505_v8, %v6553_v61 }
 0x203   : > { %5250 = vrcp.f32 %v3800_v32  ;;  %v3801_v14 = vadd.f32 1.0, %v5239_v50  ;;  %v4304_v57 = vmul.f32 -1.442695, %v6614_v7  ;;  %v6623_v45 = vadd.f32 %v4857_v36, %v6572_v42 }
 0x204   : > { %5252 = vrcp.f32 %v3803_v3  ;;  %v4302_v11 = vmul.f32 -1.442695, %v6618_v60  ;;  %v6627_v19 = vadd.f32 %v4858_v25, %v6572_v42 }
 0x205   : > { %5254 = vrcp.f32 %v3801_v14  ;;  %v4305_v61 = vmul.f32 -1.442695, %v6623_v45 }
 0x206   : > { %5256 = vpow2.f32 %v4304_v57  ;;  %v4303_v35 = vmul.f32 -1.442695, %v6627_v19  ;;  %v4823_v55 = vpop.f32.mrb[12].mxu0 }
 0x207   : > { %v5241_v34 = vpop.eup %5240  ;;  %5258 = vpow2.f32 %v4302_v11  ;;  %v4859_v49 = vadd.f32 %v4823_v55, %v6555_v28  ;;  %v3518_v23 = vpop.f32.mrb[13].mxu0 }
 0x208   : > { %v5243_v1 = vpop.eup %5242  ;;  %v3806_v4 = vadd.f32 1.0, %v5241_v34  ;;  %5260 = vpow2.f32 %v4305_v61  ;;  %v4860_v24 = vadd.f32 %v3518_v23, %v6557_v2  ;;  %v4824_v63 = vpop.f32.mrb[14].mxu0 }
 0x209   : > { %v5245_v12 = vpop.eup %5244  ;;  %v3804_v52 = vadd.f32 1.0, %v5243_v1  ;;  %5262 = vpow2.f32 %v4303_v35  ;;  %v6640_v20 = vadd.f32 %v4859_v49, %v6572_v42  ;;  %v4861_v43 = vadd.f32 %v4824_v63, %v6559_v51  ;;  %v3521_v62 = vpop.f32.mrb[15].mxu0 }
 0x20a   : > { %v5247_v59 = vpop.eup %5246  ;;  %5264 = vrcp.f32 %v3806_v4  ;;  %v3807_v28 = vadd.f32 1.0, %v5245_v12  ;;  %v6644_v16 = vadd.f32 %v4860_v24, %v6572_v42  ;;  %v4862_v5 = vadd.f32 %v3521_v62, %v6561_v46 }
 0x20b   : > { %5266 = vrcp.f32 %v3804_v52  ;;  %v3805_v2 = vadd.f32 1.0, %v5247_v59  ;;  %v4308_v15 = vmul.f32 -1.442695, %v6640_v20  ;;  %v6649_v37 = vadd.f32 %v4861_v43, %v6572_v42 }
 0x20c   : > { %v5249_v58 = vpop.eup %5248  ;;  %5268 = vrcp.f32 %v3807_v28  ;;  %v4306_v51 = vmul.f32 -1.442695, %v6644_v16  ;;  %v6658_v46 = vadd.f32 %v4862_v5, %v6572_v42 }
 0x20d   : > { %v5251_v31 = vpop.eup %5250  ;;  %v3910_v48 = vmul.f32 %v5249_v58, %v6577_v44  ;;  %5270 = vrcp.f32 %v3805_v2  ;;  %v4309_v41 = vmul.f32 -1.442695, %v6649_v37 }
 0x20e   : > { %v5253_v9 = vpop.eup %5252  ;;  %v3908_v18 = vmul.f32 %v5251_v31, %v6580_v29  ;;  %5272 = vpow2.f32 %v4308_v15  ;;  %v4307_v22 = vmul.f32 -1.442695, %v6658_v46  ;;  %v4827_v53 = vpop.f32.mrb[16].mxu0 }
 0x20f   : > { %v5255_v27 = vpop.eup %5254  ;;  %3947 = vst.msk [vmem:[%s6654_s19 + $0x10] sm:$0xff] %vm3944_vm9, %v3910_v48  ;;  %v3911_v56 = vmul.f32 %v5253_v9, %v6584_v21  ;;  %5274 = vpow2.f32 %v4306_v51  ;;  %v4863_v40 = vadd.f32 %v4827_v53, %v6563_v47  ;;  %v3534_v44 = vpop.f32.mrb[17].mxu0 }
 0x210   : > { %v5257_v10 = vpop.eup %5256  ;;  %3945 = vst.msk [vmem:[%s6654_s19] sm:$0xff] %vm3944_vm9, %v3908_v18  ;;  %v3909_v29 = vmul.f32 %v5255_v27, %v6588_v26  ;;  %5276 = vpow2.f32 %v4309_v41  ;;  %v4864_v6 = vadd.f32 %v3534_v44, %v6565_v0  ;;  %v4828_v13 = vpop.f32.mrb[18].mxu0 }
 0x211   : > { %v5259_v32 = vpop.eup %5258  ;;  %3948 = vst.msk [vmem:[%s6654_s19 + $0x18] sm:$0xff] %vm3944_vm9, %v3911_v56  ;;  %v3810_v36 = vadd.f32 1.0, %v5257_v10  ;;  %5278 = vpow2.f32 %v4307_v22  ;;  %v6675_v21 = vadd.f32 %v4863_v40, %v6572_v42  ;;  %v4865_v47 = vadd.f32 %v4828_v13, %v6567_v54  ;;  %v3537_v8 = vpop.f32.mrb[19].mxu0 }
 0x212   : > { %v5261_v50 = vpop.eup %5260  ;;  %3946 = vst.msk [vmem:[%s6654_s19 + $0x8] sm:$0xff] %vm3944_vm9, %v3909_v29  ;;  %v3808_v3 = vadd.f32 1.0, %v5259_v32  ;;  %v6681_v26 = vadd.f32 %v4864_v6, %v6572_v42  ;;  %v4866_v0 = vadd.f32 %v3537_v8, %v6574_v30 }
 0x213   : > { %v5263_v25 = vpop.eup %5262  ;;  %5280 = vrcp.f32 %v3810_v36  ;;  %v3811_v14 = vadd.f32 1.0, %v5261_v50  ;;  %v4312_v57 = vmul.f32 -1.442695, %v6675_v21  ;;  %v6686_v11 = vadd.f32 %v4865_v47, %v6572_v42  ;;  %v4679_v34 = vpop.f32.mrb[20].mxu1 }
 0x214   : > { %v5265_v61 = vpop.eup %5264  ;;  %5282 = vrcp.f32 %v3808_v3  ;;  %v3809_v54 = vadd.f32 1.0, %v5263_v25  ;;  %v4310_v35 = vmul.f32 -1.442695, %v6681_v26  ;;  %v6690_v55 = vadd.f32 %v4866_v0, %v6572_v42  ;;  %v2011_v1 = vpop.f32.mrb[21].mxu1 }
 0x215   : > { %v5267_v49 = vpop.eup %5266  ;;  %v3914_v30 = vmul.f32 %v5265_v61, %v6593_v33  ;;  %5284 = vrcp.f32 %v3811_v14  ;;  %v4313_v23 = vmul.f32 -1.442695, %v6686_v11  ;;  %v4680_v12 = vpop.f32.mrb[22].mxu1 }
 0x216   : > { %v5269_v4 = vpop.eup %5268  ;;  %v3912_v24 = vmul.f32 %v5267_v49, %v6596_v39  ;;  %5286 = vrcp.f32 %v3809_v54  ;;  %v4311_v63 = vmul.f32 -1.442695, %v6690_v55  ;;  %v4831_v52 = vpop.f32.mrb[20].mxu0 }
 0x217   : > { %v5271_v43 = vpop.eup %5270  ;;  %3951 = vst.msk [vmem:[%s6654_s19 + $0x30] sm:$0xff] %vm3944_vm9, %v3914_v30  ;;  %v3915_v62 = vmul.f32 %v5269_v4, %v6600_v17  ;;  %5288 = vpow2.f32 %v4312_v57  ;;  %v2014_v33 = vpop.f32.mrb[23].mxu1  ;;  %v4867_v59 = vadd.f32 %v4831_v52, %v4679_v34 }
 0x218   : > { %v3550_v28 = vpop.f32.mrb[21].mxu0  ;;  %v5273_v5 = vpop.eup %5272  ;;  %3949 = vst.msk [vmem:[%s6654_s19 + $0x20] sm:$0xff] %vm3944_vm9, %v3912_v24  ;;  %v3913_v39 = vmul.f32 %v5271_v43, %v6604_v38  ;;  %5290 = vpow2.f32 %v4310_v35 }
 0x219   : > { %v4868_v2 = vadd.f32 %v3550_v28, %v2011_v1  ;;  %v4832_v15 = vpop.f32.mrb[22].mxu0  ;;  %v5275_v58 = vpop.eup %5274  ;;  %3952 = vst.msk [vmem:[%s6654_s19 + $0x38] sm:$0xff] %vm3944_vm9, %v3915_v62  ;;  %v3814_v51 = vadd.f32 1.0, %v5273_v5  ;;  %5292 = vpow2.f32 %v4313_v23  ;;  %v6705_v17 = vadd.f32 %v4867_v59, %v6572_v42 }
 0x21a   : > { %v4869_v31 = vadd.f32 %v4832_v15, %v4680_v12  ;;  %v3553_v48 = vpop.f32.mrb[23].mxu0  ;;  %v5277_v41 = vpop.eup %5276  ;;  %3950 = vst.msk [vmem:[%s6654_s19 + $0x28] sm:$0xff] %vm3944_vm9, %v3913_v39  ;;  %v3812_v9 = vadd.f32 1.0, %v5275_v58  ;;  %5294 = vpow2.f32 %v4311_v63 }
 0x21b   : > { %v6710_v38 = vadd.f32 %v4868_v2, %v6572_v42  ;;  %v4870_v18 = vadd.f32 %v3553_v48, %v2014_v33  ;;  %v5279_v22 = vpop.eup %5278  ;;  %5296 = vrcp.f32 %v3814_v51  ;;  %v3815_v53 = vadd.f32 1.0, %v5277_v41  ;;  %v4683_v29 = vpop.f32.mrb[24].mxu1 }
 0x21c   : > { %v4316_v27 = vmul.f32 -1.442695, %v6705_v17  ;;  %v6714_v56 = vadd.f32 %v4869_v31, %v6572_v42  ;;  %5298 = vrcp.f32 %v3812_v9  ;;  %v3813_v40 = vadd.f32 1.0, %v5279_v22  ;;  %v2027_v32 = vpop.f32.mrb[25].mxu1 }
 0x21d   : > { %v4314_v44 = vmul.f32 -1.442695, %v6710_v38  ;;  %v6718_v10 = vadd.f32 %v4870_v18, %v6572_v42  ;;  %v5281_v6 = vpop.eup %5280  ;;  %5300 = vrcp.f32 %v3815_v53  ;;  %v4684_v50 = vpop.f32.mrb[26].mxu1 }
 0x21e   : > { %v4317_v13 = vmul.f32 -1.442695, %v6714_v56  ;;  %v5283_v36 = vpop.eup %5282  ;;  %v3918_v47 = vmul.f32 %v5281_v6, %v6614_v7  ;;  %5302 = vrcp.f32 %v3813_v40  ;;  %v4835_v3 = vpop.f32.mrb[24].mxu0 }
 0x21f   : > { %v4315_v8 = vmul.f32 -1.442695, %v6718_v10  ;;  %v5285_v0 = vpop.eup %5284  ;;  %v3916_v25 = vmul.f32 %v5283_v36, %v6618_v60  ;;  %5304 = vpow2.f32 %v4316_v27  ;;  %v2030_v14 = vpop.f32.mrb[27].mxu1  ;;  %v4871_v57 = vadd.f32 %v4835_v3, %v4683_v29 }
 0x220   : > { %v3566_v61 = vpop.f32.mrb[25].mxu0  ;;  %v5287_v54 = vpop.eup %5286  ;;  %3955 = vst.msk [vmem:[%s6654_s19 + $0x50] sm:$0xff] %vm3944_vm9, %v3918_v47  ;;  %v3919_v35 = vmul.f32 %v5285_v0, %v6623_v45  ;;  %5306 = vpow2.f32 %v4314_v44 }
 0x221   : > { %v4872_v7 = vadd.f32 %v3566_v61, %v2027_v32  ;;  %v4836_v34 = vpop.f32.mrb[26].mxu0  ;;  %v5289_v49 = vpop.eup %5288  ;;  %3953 = vst.msk [vmem:[%s6654_s19 + $0x40] sm:$0xff] %vm3944_vm9, %v3916_v25  ;;  %v3917_v30 = vmul.f32 %v5287_v54, %v6627_v19  ;;  %5308 = vpow2.f32 %v4317_v13  ;;  %v6731_v60 = vadd.f32 %v4871_v57, %v6572_v42 }
 0x222   : > { %v4873_v23 = vadd.f32 %v4836_v34, %v4684_v50  ;;  %v3569_v1 = vpop.f32.mrb[27].mxu0  ;;  %v5291_v4 = vpop.eup %5290  ;;  %3956 = vst.msk [vmem:[%s6654_s19 + $0x58] sm:$0xff] %vm3944_vm9, %v3919_v35  ;;  %v3818_v24 = vadd.f32 1.0, %v5289_v49  ;;  %5310 = vpow2.f32 %v4315_v8 }
 0x223   : > { %v6736_v45 = vadd.f32 %v4872_v7, %v6572_v42  ;;  %v4874_v63 = vadd.f32 %v3569_v1, %v2030_v14  ;;  %v5293_v12 = vpop.eup %5292  ;;  %3954 = vst.msk [vmem:[%s6654_s19 + $0x48] sm:$0xff] %vm3944_vm9, %v3917_v30  ;;  %v3816_v52 = vadd.f32 1.0, %v5291_v4  ;;  %v4320_v33 = vmul.f32 -1.442695, %v6731_v60  ;;  %v4687_v28 = vpop.f32.mrb[28].mxu1 }
 0x224   : > { %v6741_v19 = vadd.f32 %v4873_v23, %v6572_v42  ;;  %v5295_v43 = vpop.eup %5294  ;;  %5312 = vrcp.f32 %v3818_v24  ;;  %v3819_v62 = vadd.f32 1.0, %v5293_v12  ;;  %v2043_v15 = vpop.f32.mrb[29].mxu1 }
 0x225   : > { %v6745_v59 = vadd.f32 %v4874_v63, %v6572_v42  ;;  %v5297_v5 = vpop.eup %5296  ;;  %5314 = vrcp.f32 %v3816_v52  ;;  %v3817_v39 = vadd.f32 1.0, %v5295_v43  ;;  %v4318_v2 = vmul.f32 -1.442695, %v6736_v45  ;;  %v4688_v48 = vpop.f32.mrb[30].mxu1 }
 0x226   : > { %v5299_v58 = vpop.eup %5298  ;;  %v3922_v51 = vmul.f32 %v5297_v5, %v6640_v20  ;;  %5316 = vrcp.f32 %v3819_v62  ;;  %v4321_v31 = vmul.f32 -1.442695, %v6741_v19  ;;  %v4839_v41 = vpop.f32.mrb[28].mxu0 }
 0x227   : > { %v5301_v9 = vpop.eup %5300  ;;  %v3920_v18 = vmul.f32 %v5299_v58, %v6644_v16  ;;  %5318 = vrcp.f32 %v3817_v39  ;;  %v4319_v22 = vmul.f32 -1.442695, %v6745_v59  ;;  %v2046_v53 = vpop.f32.mrb[31].mxu1  ;;  %v4875_v27 = vadd.f32 %v4839_v41, %v4687_v28 }
 0x228   : > { %v3582_v40 = vpop.f32.mrb[29].mxu0  ;;  %v5303_v44 = vpop.eup %5302  ;;  %3959 = vst.msk [vmem:[%s6654_s19 + $0x70] sm:$0xff] %vm3944_vm9, %v3922_v51  ;;  %v3923_v20 = vmul.f32 %v5301_v9, %v6649_v37  ;;  %5320 = vpow2.f32 %v4320_v33 }
 0x229   : > { %v4876_v29 = vadd.f32 %v3582_v40, %v2043_v15  ;;  %v4840_v6 = vpop.f32.mrb[30].mxu0  ;;  %v5305_v13 = vpop.eup %5304  ;;  %3957 = vst.msk [vmem:[%s6654_s19 + $0x60] sm:$0xff] %vm3944_vm9, %v3920_v18  ;;  %v3921_v16 = vmul.f32 %v5303_v44, %v6658_v46  ;;  %5322 = vpow2.f32 %v4318_v2  ;;  %v6759_v32 = vadd.f32 %v4875_v27, %v6572_v42 }
 0x22a   : > { %v4877_v36 = vadd.f32 %v4840_v6, %v4688_v48  ;;  %v3585_v47 = vpop.f32.mrb[31].mxu0  ;;  %v5307_v8 = vpop.eup %5306  ;;  %3960 = vst.msk [vmem:[%s6654_s19 + $0x78] sm:$0xff] %vm3944_vm9, %v3923_v20  ;;  %v3822_v50 = vadd.f32 1.0, %v5305_v13  ;;  %5324 = vpow2.f32 %v4321_v31 }
 0x22b   : > { %v6764_v37 = vadd.f32 %v4876_v29, %v6572_v42  ;;  %v4878_v3 = vadd.f32 %v3585_v47, %v2046_v53  ;;  %v5309_v0 = vpop.eup %5308  ;;  %3958 = vst.msk [vmem:[%s6654_s19 + $0x68] sm:$0xff] %vm3944_vm9, %v3921_v16  ;;  %v3820_v25 = vadd.f32 1.0, %v5307_v8  ;;  %5326 = vpow2.f32 %v4319_v22  ;;  %v4691_v35 = vpop.f32.mrb[32].mxu1 }
 0x22c   : > { %v6769_v46 = vadd.f32 %v4877_v36, %v6572_v42  ;;  %v5311_v14 = vpop.eup %5310  ;;  %5328 = vrcp.f32 %v3822_v50  ;;  %v3823_v57 = vadd.f32 1.0, %v5309_v0  ;;  %v4324_v61 = vmul.f32 -1.442695, %v6759_v32  ;;  %v2059_v49 = vpop.f32.mrb[33].mxu1 }
 0x22d   : > { %v6773_v54 = vadd.f32 %v4878_v3, %v6572_v42  ;;  %5330 = vrcp.f32 %v3820_v25  ;;  %v3821_v7 = vadd.f32 1.0, %v5311_v14  ;;  %v4322_v34 = vmul.f32 -1.442695, %v6764_v37  ;;  %v4692_v1 = vpop.f32.mrb[34].mxu1 }
 0x22e   : > { %v5313_v30 = vpop.eup %5312  ;;  %5332 = vrcp.f32 %v3823_v57  ;;  %v4325_v23 = vmul.f32 -1.442695, %v6769_v46  ;;  %v4843_v4 = vpop.f32.mrb[32].mxu0 }
 0x22f   : > { %v5315_v24 = vpop.eup %5314  ;;  %v3926_v63 = vmul.f32 %v5313_v30, %v6675_v21  ;;  %5334 = vrcp.f32 %v3821_v7  ;;  %v4323_v12 = vmul.f32 -1.442695, %v6773_v54  ;;  %v2062_v52 = vpop.f32.mrb[35].mxu1  ;;  %v4879_v43 = vadd.f32 %v4843_v4, %v4691_v35 }
 0x230   : > { %v3598_v62 = vpop.f32.mrb[33].mxu0  ;;  %v5317_v33 = vpop.eup %5316  ;;  %v3924_v28 = vmul.f32 %v5315_v24, %v6681_v26  ;;  %5336 = vpow2.f32 %v4324_v61 }
 0x231   : > { %v4880_v5 = vadd.f32 %v3598_v62, %v2059_v49  ;;  %v4844_v39 = vpop.f32.mrb[34].mxu0  ;;  %v5319_v2 = vpop.eup %5318  ;;  %3963 = vst.msk [vmem:[%s6654_s19 + $0x90] sm:$0xff] %vm3944_vm9, %v3926_v63  ;;  %v3927_v15 = vmul.f32 %v5317_v33, %v6686_v11  ;;  %5338 = vpow2.f32 %v4322_v34  ;;  %v6784_v21 = vadd.f32 %v4879_v43, %v6572_v42 }
 0x232   : > { %v4881_v58 = vadd.f32 %v4844_v39, %v4692_v1  ;;  %v3601_v51 = vpop.f32.mrb[35].mxu0  ;;  %v5321_v31 = vpop.eup %5320  ;;  %3961 = vst.msk [vmem:[%s6654_s19 + $0x80] sm:$0xff] %vm3944_vm9, %v3924_v28  ;;  %v3925_v26 = vmul.f32 %v5319_v2, %v6690_v55  ;;  %5340 = vpow2.f32 %v4325_v23 }
 0x233   : > { %v6790_v48 = vadd.f32 %v4880_v5, %v6572_v42  ;;  %v4882_v41 = vadd.f32 %v3601_v51, %v2062_v52  ;;  %v5323_v9 = vpop.eup %5322  ;;  %3964 = vst.msk [vmem:[%s6654_s19 + $0x98] sm:$0xff] %vm3944_vm9, %v3927_v15  ;;  %v3826_v11 = vadd.f32 1.0, %v5321_v31  ;;  %5342 = vpow2.f32 %v4323_v12 }
 0x234   : > { %v6795_v18 = vadd.f32 %v4881_v58, %v6572_v42  ;;  %v5325_v22 = vpop.eup %5324  ;;  %3962 = vst.msk [vmem:[%s6654_s19 + $0x88] sm:$0xff] %vm3944_vm9, %v3925_v26  ;;  %v3824_v53 = vadd.f32 1.0, %v5323_v9  ;;  %v4328_v44 = vmul.f32 -1.442695, %v6784_v21 }
 0x235   : > { %v6800_v27 = vadd.f32 %v4882_v41, %v6572_v42  ;;  %v5327_v55 = vpop.eup %5326  ;;  %5344 = vrcp.f32 %v3826_v11  ;;  %v3827_v40 = vadd.f32 1.0, %v5325_v22  ;;  %v4326_v6 = vmul.f32 -1.442695, %v6790_v48 }
 0x236   : > { %v5329_v20 = vpop.eup %5328  ;;  %5346 = vrcp.f32 %v3824_v53  ;;  %v3825_v29 = vadd.f32 1.0, %v5327_v55  ;;  %v4329_v42 = vmul.f32 -1.442695, %v6795_v18 }
 0x237   : > { %v5331_v13 = vpop.eup %5330  ;;  %v3930_v16 = vmul.f32 %v5329_v20, %v6705_v17  ;;  %5348 = vrcp.f32 %v3827_v40  ;;  %v4327_v8 = vmul.f32 -1.442695, %v6800_v27 }
 0x238   : > { %v5333_v36 = vpop.eup %5332  ;;  %v3928_v47 = vmul.f32 %v5331_v13, %v6710_v38  ;;  %5350 = vrcp.f32 %v3825_v29 }
 0x239   : > { %v5335_v50 = vpop.eup %5334  ;;  %3967 = vst.msk [vmem:[%s6654_s19 + $0xb0] sm:$0xff] %vm3944_vm9, %v3930_v16  ;;  %v3931_v3 = vmul.f32 %v5333_v36, %v6714_v56  ;;  %5352 = vpow2.f32 %v4328_v44 }
 0x23a   : > { %v5337_v0 = vpop.eup %5336  ;;  %3965 = vst.msk [vmem:[%s6654_s19 + $0xa0] sm:$0xff] %vm3944_vm9, %v3928_v47  ;;  %v3929_v17 = vmul.f32 %v5335_v50, %v6718_v10  ;;  %5354 = vpow2.f32 %v4326_v6 }
 0x23b   : > { %v5339_v25 = vpop.eup %5338  ;;  %3968 = vst.msk [vmem:[%s6654_s19 + $0xb8] sm:$0xff] %vm3944_vm9, %v3931_v3  ;;  %v3830_v38 = vadd.f32 1.0, %v5337_v0  ;;  %5356 = vpow2.f32 %v4329_v42 }
 0x23c   : > { %v5341_v14 = vpop.eup %5340  ;;  %3966 = vst.msk [vmem:[%s6654_s19 + $0xa8] sm:$0xff] %vm3944_vm9, %v3929_v17  ;;  %v3828_v57 = vadd.f32 1.0, %v5339_v25  ;;  %5358 = vpow2.f32 %v4327_v8 }
 0x23d   : > { %v5343_v61 = vpop.eup %5342  ;;  %5360 = vrcp.f32 %v3830_v38  ;;  %v3831_v56 = vadd.f32 1.0, %v5341_v14 }
 0x23e   : > { %5362 = vrcp.f32 %v3828_v57  ;;  %v3829_v35 = vadd.f32 1.0, %v5343_v61 }
 0x23f   : > { %v5345_v10 = vpop.eup %5344  ;;  %5364 = vrcp.f32 %v3831_v56 }
 0x240   : > { %v5347_v7 = vpop.eup %5346  ;;  %v3934_v34 = vmul.f32 %v5345_v10, %v6731_v60  ;;  %5366 = vrcp.f32 %v3829_v35 }
 0x241   : > { %v5349_v49 = vpop.eup %5348  ;;  %v3932_v30 = vmul.f32 %v5347_v7, %v6736_v45 }
 0x242   : > { %v5351_v23 = vpop.eup %5350  ;;  %3971 = vst.msk [vmem:[%s6654_s19 + $0xd0] sm:$0xff] %vm3944_vm9, %v3934_v34  ;;  %v3935_v1 = vmul.f32 %v5349_v49, %v6741_v19 }
 0x243   : > { %v5353_v4 = vpop.eup %5352  ;;  %3969 = vst.msk [vmem:[%s6654_s19 + $0xc0] sm:$0xff] %vm3944_vm9, %v3932_v30  ;;  %v3933_v24 = vmul.f32 %v5351_v23, %v6745_v59 }
 0x244   : > { %v5355_v63 = vpop.eup %5354  ;;  %3972 = vst.msk [vmem:[%s6654_s19 + $0xd8] sm:$0xff] %vm3944_vm9, %v3935_v1  ;;  %v3834_v12 = vadd.f32 1.0, %v5353_v4 }
 0x245   : > { %v5357_v52 = vpop.eup %5356  ;;  %3970 = vst.msk [vmem:[%s6654_s19 + $0xc8] sm:$0xff] %vm3944_vm9, %v3933_v24  ;;  %v3832_v60 = vadd.f32 1.0, %v5355_v63 }
 0x246   : > { %v5359_v45 = vpop.eup %5358  ;;  %5368 = vrcp.f32 %v3834_v12  ;;  %v3835_v43 = vadd.f32 1.0, %v5357_v52 }
 0x247   : > { %v5361_v19 = vpop.eup %5360  ;;  %5370 = vrcp.f32 %v3832_v60  ;;  %v3833_v62 = vadd.f32 1.0, %v5359_v45 }
 0x248   : > { %v5363_v33 = vpop.eup %5362  ;;  %v3938_v59 = vmul.f32 %v5361_v19, %v6759_v32  ;;  %5372 = vrcp.f32 %v3835_v43 }
 0x249   : > { %v5365_v28 = vpop.eup %5364  ;;  %v3936_v5 = vmul.f32 %v5363_v33, %v6764_v37  ;;  %5374 = vrcp.f32 %v3833_v62 }
 0x24a   : > { %v5367_v39 = vpop.eup %5366  ;;  %3975 = vst.msk [vmem:[%s6654_s19 + $0xf0] sm:$0xff] %vm3944_vm9, %v3938_v59  ;;  %v3939_v2 = vmul.f32 %v5365_v28, %v6769_v46 }
 0x24b   : > { %3973 = vst.msk [vmem:[%s6654_s19 + $0xe0] sm:$0xff] %vm3944_vm9, %v3936_v5  ;;  %v3937_v15 = vmul.f32 %v5367_v39, %v6773_v54 }
 0x24c   : > { %3976 = vst.msk [vmem:[%s6654_s19 + $0xf8] sm:$0xff] %vm3944_vm9, %v3939_v2 }
 0x24d   : > { %3974 = vst.msk [vmem:[%s6654_s19 + $0xe8] sm:$0xff] %vm3944_vm9, %v3937_v15 }
 0x250   : > { %v5369_v32 = vpop.eup %5368 }
 0x251   : > { %v5371_v58 = vpop.eup %5370  ;;  %v3942_v37 = vmul.f32 %v5369_v32, %v6784_v21 }
 0x252   : > { %v5373_v51 = vpop.eup %5372  ;;  %v3940_v31 = vmul.f32 %v5371_v58, %v6790_v48 }
 0x253   : > { %v5375_v26 = vpop.eup %5374  ;;  %3979 = vst.msk [vmem:[%s6654_s19 + $0x110] sm:$0xff] %vm3944_vm9, %v3942_v37  ;;  %v3943_v46 = vmul.f32 %v5373_v51, %v6795_v18 }
 0x254   : > { %3977 = vst.msk [vmem:[%s6654_s19 + $0x100] sm:$0xff] %vm3944_vm9, %v3940_v31  ;;  %v3941_v54 = vmul.f32 %v5375_v26, %v6800_v27 }
 0x255   : > { %3980 = vst.msk [vmem:[%s6654_s19 + $0x118] sm:$0xff] %vm3944_vm9, %v3943_v46 }
 0x256   : > { %3978 = vst.msk [vmem:[%s6654_s19 + $0x108] sm:$0xff] %vm3944_vm9, %v3941_v54 }
 0x257 PF: > { %s13_s12 = sadd.s32 1, %s5403_s12  }
 0x258   : > { %p10_p5 = scmp.ge.s32.totalorder %s13_s12, 4  }
 0x25a   :  { %12 = sbr.rel (!%p10_p5) target bundleno = 1 (0x1), region = 70 }

</bundles_post_ra>
